<compile_context>
chip_gen: v7x
topology: tpu7x:2x2x1
jax: 0.10.0
libtpu: 0.0.40
codegen_flags: <defaults>
</compile_context>

<pallas_src>
import functools

import jax
import jax.numpy as jnp
import numpy as np
from jax.experimental import pallas as pl
from jax.experimental.pallas import tpu as pltpu


def _mha_kernel(q_ref, k_ref, v_ref,
                wq_ref, bq_ref, wk_ref, bk_ref, wv_ref, bv_ref,
                wfc_ref, bfc_ref, gamma_ref, beta_ref,
                out_ref, *attn_refs,
                n_head, d_k, d_v, eps, compute_dtype):
    attn_ref = attn_refs[0] if attn_refs else None

    b_tile, tq, d_model = q_ref.shape
    len_k = k_ref.shape[1]
    rows_q = b_tile * tq
    rows_k = b_tile * len_k

    # Flatten batch into matmul rows (leading-dim merge: free when tq % 8 == 0).
    q_res = q_ref[...].reshape(rows_q, d_model)                 # f32 residual
    xq = q_res.astype(compute_dtype)
    xk = k_ref[...].reshape(rows_k, d_model).astype(compute_dtype)
    xv = v_ref[...].reshape(rows_k, d_model).astype(compute_dtype)

    # Combined, lane-dense projections: one 2-D MXU matmul each with
    # N = n_head*d_k (or n_head*d_v) lanes and f32 accumulation.
    # (1/temperature is already folded into wq/bq by the wrapper.)
    qc = jnp.dot(xq, wq_ref[...], preferred_element_type=jnp.float32) + bq_ref[...]
    kc = jnp.dot(xk, wk_ref[...], preferred_element_type=jnp.float32) + bk_ref[...]
    vc = jnp.dot(xv, wv_ref[...], preferred_element_type=jnp.float32) + bv_ref[...]

    qc = qc.astype(compute_dtype)
    kc = kc.astype(compute_dtype)
    vc = vc.astype(compute_dtype)

    # Head split: static lane slices + leading-dim stack -> head-major groups
    # (g = n_head * b_tile), matching the reference (n_head, sz_b, len, d)
    # ordering.  At 128-aligned head widths these slices are relayout-free.
    def split_heads(x, length, d):
        parts = [x[:, h * d:(h + 1) * d] for h in range(n_head)]
        return jnp.stack(parts, axis=0).reshape(n_head * b_tile, length, d)

    qh = split_heads(qc, tq, d_k)        # (g, tq, d_k)
    kh = split_heads(kc, len_k, d_k)     # (g, len_k, d_k)
    vh = split_heads(vc, len_k, d_v)     # (g, len_k, d_v)

    # Scaled dot-product attention, batched over (head, batch); no kh.T
    # materialisation (contract last dims directly).  Softmax math in f32.
    scores = jnp.einsum("gqe,gke->gqk", qh, kh,
                        preferred_element_type=jnp.float32)
    scores = scores - jnp.max(scores, axis=-1, keepdims=True)
    p = jnp.exp(scores)
    attn = p * pl.reciprocal(jnp.sum(p, axis=-1, keepdims=True), approx=True)

    if attn_ref is not None:
        # One lane-dense store, already in head-major (n_head, b, q, k) layout.
        attn_ref[...] = attn.reshape(n_head, b_tile, tq, len_k).astype(attn_ref.dtype)

    ctx = jnp.einsum("gqk,gke->gqe", attn.astype(compute_dtype), vh,
                     preferred_element_type=jnp.float32)        # (g, tq, d_v)

    # Merge heads along the contraction dim -> (rows_q, n_head*d_v); the head
    # reduction then happens inside the MXU f32 accumulator (K = n_head*d_v).
    ctx4 = ctx.reshape(n_head, b_tile, tq, d_v).astype(compute_dtype)
    ctx_cat = jnp.concatenate(
        [ctx4[h].reshape(rows_q, d_v) for h in range(n_head)], axis=-1)
    proj = jnp.dot(ctx_cat, wfc_ref[...],
                   preferred_element_type=jnp.float32) + bfc_ref[...]

    # Residual + LayerNorm (f32 math on the VPU/EUP).
    x = proj + q_res
    mean = jnp.mean(x, axis=-1, keepdims=True)
    var = jnp.mean((x - mean) ** 2, axis=-1, keepdims=True)
    normed = (x - mean) * jax.lax.rsqrt(var + eps)
    out = normed * gamma_ref[...] + beta_ref[...]
    out_ref[...] = out.reshape(b_tile, tq, d_model).astype(out_ref.dtype)


def _vmem_bytes_estimate(batch_tile, q_tile, len_k, d_model, n_head, d_k, d_v,
                         w_bytes, attn_out_bytes):
    """Rough per-step VMEM footprint (pipelined blocks + live intermediates)."""
    f32 = 4
    rows_q = batch_tile * q_tile
    rows_k = batch_tile * len_k
    blocks = 2 * rows_q * d_model * f32                        # q in (x2 buf)
    blocks += 2 * 2 * rows_k * d_model * f32                   # k, v in
    blocks += 2 * rows_q * d_model * f32                       # out
    blocks += 2 * n_head * rows_q * len_k * max(attn_out_bytes, 0)   # attn out
    blocks += 2 * (2 * d_model * n_head * d_k + d_model * n_head * d_v
                   + n_head * d_v * d_model) * w_bytes          # weights
    blocks += 2 * (2 * n_head * d_k + n_head * d_v + 3 * d_model) * f32
    inter = 3 * n_head * rows_q * len_k * f32                   # scores/p/attn
    inter += 2 * (rows_q * n_head * d_k + rows_k * n_head * (d_k + d_v)) * f32
    inter += 2 * rows_q * n_head * d_v * f32 + 2 * rows_q * d_model * f32
    return blocks + inter


def multi_head_attention(q, k, v, params, *, n_head, d_k, d_v,
                         compute_dtype=jnp.bfloat16,
                         attn_dtype=jnp.float32,
                         return_attn=True,
                         batch_tile=None, q_tile=None):
    """q, k, v: (sz_b, len, d_model). Returns (output, attn) matching PyTorch."""
    sz_b, len_q, d_model = q.shape
    _, len_k, _ = k.shape
    inv_t = 1.0 / float(np.power(d_k, 0.5))
    eps = 1e-5

    # Weight plumbing (outside the kernel): combined lane-dense layouts,
    # 1/temperature folded into Q projection, MXU operands in compute_dtype.
    wq = (params["w_qs"] * inv_t).astype(compute_dtype)   # (d_model, n_head*d_k)
    wk = params["w_ks"].astype(compute_dtype)
    wv = params["w_vs"].astype(compute_dtype)
    bq = params["b_qs"] * inv_t                           # (1, n_head*d_k), f32
    bk = params["b_ks"]
    bv = params["b_vs"]
    wfc = params["w_fc"].astype(compute_dtype)            # (n_head*d_v, d_model)
    bfc = params["b_fc"]
    gamma = params["ln_gamma"]
    beta = params["ln_beta"]

    # Tile selection: deep grid (batch_tile=1) for pipeline depth on single-TC
    # chips; q_tile derived from a VMEM budget so attention blocks fit v7x.
    if batch_tile is None:
        batch_tile = 1
    assert sz_b % batch_tile == 0

    w_bytes = jnp.dtype(compute_dtype).itemsize
    attn_bytes = jnp.dtype(attn_dtype).itemsize if return_attn else 0

    if q_tile is None:
        q_tile = len_q
        budget = 40 << 20   # headroom under v7x's 64 MiB physical VMEM
        while (q_tile > 8 and q_tile % 16 == 0 and
               _vmem_bytes_estimate(batch_tile, q_tile, len_k, d_model, n_head,
                                    d_k, d_v, w_bytes, attn_bytes) > budget):
            q_tile //= 2
    assert len_q % q_tile == 0
    assert q_tile == len_q or q_tile % 8 == 0

    est = _vmem_bytes_estimate(batch_tile, q_tile, len_k, d_model, n_head,
                               d_k, d_v, w_bytes, attn_bytes)
    vmem_limit = int(min(max(2 * est, 32 << 20), 64 << 20))

    num_b = sz_b // batch_tile
    num_q = len_q // q_tile
    resident = lambda b, qi: (0, 0)

    in_specs = [
        pl.BlockSpec((batch_tile, q_tile, d_model), lambda b, qi: (b, qi, 0)),
        pl.BlockSpec((batch_tile, len_k, d_model), lambda b, qi: (b, 0, 0)),
        pl.BlockSpec((batch_tile, len_k, d_model), lambda b, qi: (b, 0, 0)),
        pl.BlockSpec((d_model, n_head * d_k), resident),   # w_qs (scaled)
        pl.BlockSpec((1, n_head * d_k), resident),          # b_qs (scaled)
        pl.BlockSpec((d_model, n_head * d_k), resident),    # w_ks
        pl.BlockSpec((1, n_head * d_k), resident),          # b_ks
        pl.BlockSpec((d_model, n_head * d_v), resident),    # w_vs
        pl.BlockSpec((1, n_head * d_v), resident),          # b_vs
        pl.BlockSpec((n_head * d_v, d_model), resident),    # w_fc
        pl.BlockSpec((1, d_model), resident),               # b_fc
        pl.BlockSpec((1, d_model), resident),               # ln gamma
        pl.BlockSpec((1, d_model), resident),               # ln beta
    ]
    out_shapes = [jax.ShapeDtypeStruct((sz_b, len_q, d_model), jnp.float32)]
    out_specs = [pl.BlockSpec((batch_tile, q_tile, d_model),
                              lambda b, qi: (b, qi, 0))]
    if return_attn:
        out_shapes.append(
            jax.ShapeDtypeStruct((n_head, sz_b, len_q, len_k), attn_dtype))
        out_specs.append(
            pl.BlockSpec((n_head, batch_tile, q_tile, len_k),
                         lambda b, qi: (0, b, qi, 0)))

    kernel = functools.partial(
        _mha_kernel, n_head=n_head, d_k=d_k, d_v=d_v, eps=eps,
        compute_dtype=compute_dtype)

    results = pl.pallas_call(
        kernel,
        out_shape=tuple(out_shapes),
        grid_spec=pltpu.PrefetchScalarGridSpec(
            num_scalar_prefetch=0,
            grid=(num_b, num_q),
            in_specs=in_specs,
            out_specs=tuple(out_specs),
        ),
        compiler_params=pltpu.CompilerParams(
            dimension_semantics=("parallel", "parallel"),
            vmem_limit_bytes=vmem_limit),
    )(q, k, v, wq, bq, wk, bk, wv, bv, wfc, bfc, gamma, beta)

    if return_attn:
        out, attn = results
        # Already head-major: this reshape is free (no HBM round trip).
        return out, attn.reshape(n_head * sz_b, len_q, len_k)
    return results[0] if isinstance(results, (list, tuple)) else results


def _reference(q, k, v, params, *, n_head, d_k, d_v):
    """Plain-JAX reference for correctness checking (matches the PyTorch module)."""
    sz_b, len_q, d_model = q.shape
    temperature = float(np.power(d_k, 0.5))
    qp = q @ params["w_qs"] + params["b_qs"][0]
    kp = k @ params["w_ks"] + params["b_ks"][0]
    vp = v @ params["w_vs"] + params["b_vs"][0]
    qh = qp.reshape(sz_b, len_q, n_head, d_k).transpose(2, 0, 1, 3).reshape(-1, len_q, d_k)
    kh = kp.reshape(sz_b, len_q, n_head, d_k).transpose(2, 0, 1, 3).reshape(-1, len_q, d_k)
    vh = vp.reshape(sz_b, len_q, n_head, d_v).transpose(2, 0, 1, 3).reshape(-1, len_q, d_v)
    scores = jnp.einsum("bqd,bkd->bqk", qh, kh) / temperature
    attn = jax.nn.softmax(scores, axis=-1)
    o = jnp.einsum("bqk,bkd->bqd", attn, vh)
    o = o.reshape(n_head, sz_b, len_q, d_v).transpose(1, 2, 0, 3).reshape(sz_b, len_q, -1)
    o = o @ params["w_fc"] + params["b_fc"][0]
    x = o + q
    mean = x.mean(-1, keepdims=True)
    var = ((x - mean) ** 2).mean(-1, keepdims=True)
    out = (x - mean) / jnp.sqrt(var + 1e-5) * params["ln_gamma"][0] + params["ln_beta"][0]
    return out, attn


def init_params(key, n_head, d_model, d_k, d_v):
    ks = jax.random.split(key, 4)
    std_qk = np.sqrt(2.0 / (d_model + d_k))
    std_v = np.sqrt(2.0 / (d_model + d_v))
    std_fc = np.sqrt(2.0 / (n_head * d_v + d_model))  # xavier normal
    return {
        "w_qs": (jax.random.normal(ks[0], (d_model, n_head * d_k), jnp.float32) * std_qk),
        "b_qs": jnp.zeros((1, n_head * d_k), jnp.float32),
        "w_ks": (jax.random.normal(ks[1], (d_model, n_head * d_k), jnp.float32) * std_qk),
        "b_ks": jnp.zeros((1, n_head * d_k), jnp.float32),
        "w_vs": (jax.random.normal(ks[2], (d_model, n_head * d_v), jnp.float32) * std_v),
        "b_vs": jnp.zeros((1, n_head * d_v), jnp.float32),
        "w_fc": (jax.random.normal(ks[3], (n_head * d_v, d_model), jnp.float32) * std_fc),
        "b_fc": jnp.zeros((1, d_model), jnp.float32),
        "ln_gamma": jnp.ones((1, d_model), jnp.float32),
        "ln_beta": jnp.zeros((1, d_model), jnp.float32),
    }


if __name__ == "__main__":
    n_head, d_model, d_k, d_v = 4, 32, 8, 8
    sz_b, seq_len = 2, 8

    key = jax.random.PRNGKey(0)
    kq, kk, kv, kp = jax.random.split(key, 4)
    q = jax.random.normal(kq, (sz_b, seq_len, d_model), jnp.float32)
    k = jax.random.normal(kk, (sz_b, seq_len, d_model), jnp.float32)
    v = jax.random.normal(kv, (sz_b, seq_len, d_model), jnp.float32)
    params = init_params(kp, n_head, d_model, d_k, d_v)

    ref_out, ref_attn = _reference(q, k, v, params, n_head=n_head, d_k=d_k, d_v=d_v)

    # f32 MXU path (approx reciprocal on EUP => slightly loosened tolerance).
    out, attn = multi_head_attention(q, k, v, params, n_head=n_head, d_k=d_k,
                                     d_v=d_v, compute_dtype=jnp.float32)
    out = jax.block_until_ready(out)
    attn = jax.block_until_ready(attn)
    np.testing.assert_allclose(np.asarray(out), np.asarray(ref_out), rtol=5e-3, atol=5e-3)
    np.testing.assert_allclose(np.asarray(attn), np.asarray(ref_attn), rtol=5e-3, atol=5e-3)

    # Default bf16 MXU-input path (v5e/v6e/v7x throughput), f32 accumulation
    # + f32 softmax/LayerNorm math => loose tolerance.
    out_bf, attn_bf = multi_head_attention(q, k, v, params, n_head=n_head,
                                           d_k=d_k, d_v=d_v)
    out_bf = jax.block_until_ready(out_bf)
    attn_bf = jax.block_until_ready(attn_bf)
    np.testing.assert_allclose(np.asarray(out_bf), np.asarray(ref_out), rtol=5e-2, atol=5e-2)
    np.testing.assert_allclose(np.asarray(attn_bf), np.asarray(ref_attn), rtol=5e-2, atol=5e-2)

    print("KERNEL_OK")
</pallas_src>

<mosaic_0001>
module attributes {stable_mosaic.version = 11 : i64} {
  func.func @_mha_kernel(%arg0: i32, %arg1: i32, %arg2: memref<1x8x32xf32, #tpu.memory_space<vmem>>, %arg3: memref<1x8x32xf32, #tpu.memory_space<vmem>>, %arg4: memref<1x8x32xf32, #tpu.memory_space<vmem>>, %arg5: memref<32x32xf32, #tpu.memory_space<vmem>>, %arg6: memref<1x32xf32, #tpu.memory_space<vmem>>, %arg7: memref<32x32xf32, #tpu.memory_space<vmem>>, %arg8: memref<1x32xf32, #tpu.memory_space<vmem>>, %arg9: memref<32x32xf32, #tpu.memory_space<vmem>>, %arg10: memref<1x32xf32, #tpu.memory_space<vmem>>, %arg11: memref<32x32xf32, #tpu.memory_space<vmem>>, %arg12: memref<1x32xf32, #tpu.memory_space<vmem>>, %arg13: memref<1x32xf32, #tpu.memory_space<vmem>>, %arg14: memref<1x32xf32, #tpu.memory_space<vmem>>, %arg15: memref<1x8x32xf32, #tpu.memory_space<vmem>>, %arg16: memref<4x1x8x8xf32, #tpu.memory_space<vmem>>) attributes {dimension_semantics = [#tpu.dimension_semantics<parallel>, #tpu.dimension_semantics<parallel>], iteration_bounds = array<i64: 2, 1>, scalar_prefetch = 0 : i64, scratch_operands = 0 : i64, tpu.core_type = #tpu.core_type<tc>, window_params = [{transform_indices = @transform_0, window_bounds = array<i64: 1, 8, 32>}, {transform_indices = @transform_1, window_bounds = array<i64: 1, 8, 32>}, {transform_indices = @transform_2, window_bounds = array<i64: 1, 8, 32>}, {pipeline_mode = #tpu.pipeline_mode<synchronous>, transform_indices = @transform_3, window_bounds = array<i64: 32, 32>}, {pipeline_mode = #tpu.pipeline_mode<synchronous>, transform_indices = @transform_4, window_bounds = array<i64: 1, 32>}, {pipeline_mode = #tpu.pipeline_mode<synchronous>, transform_indices = @transform_5, window_bounds = array<i64: 32, 32>}, {pipeline_mode = #tpu.pipeline_mode<synchronous>, transform_indices = @transform_6, window_bounds = array<i64: 1, 32>}, {pipeline_mode = #tpu.pipeline_mode<synchronous>, transform_indices = @transform_7, window_bounds = array<i64: 32, 32>}, {pipeline_mode = #tpu.pipeline_mode<synchronous>, transform_indices = @transform_8, window_bounds = array<i64: 1, 32>}, {pipeline_mode = #tpu.pipeline_mode<synchronous>, transform_indices = @transform_9, window_bounds = array<i64: 32, 32>}, {pipeline_mode = #tpu.pipeline_mode<synchronous>, transform_indices = @transform_10, window_bounds = array<i64: 1, 32>}, {pipeline_mode = #tpu.pipeline_mode<synchronous>, transform_indices = @transform_11, window_bounds = array<i64: 1, 32>}, {pipeline_mode = #tpu.pipeline_mode<synchronous>, transform_indices = @transform_12, window_bounds = array<i64: 1, 32>}, {transform_indices = @transform_13, window_bounds = array<i64: 1, 8, 32>}, {transform_indices = @transform_14, window_bounds = array<i64: 4, 1, 8, 8>}]} {
    %c0 = arith.constant 0 : index
    %c0_0 = arith.constant 0 : index
    %c0_1 = arith.constant 0 : index
    %0 = vector.load %arg2[%c0, %c0_0, %c0_1] : memref<1x8x32xf32, #tpu.memory_space<vmem>>, vector<1x8x32xf32>
    %1 = vector.shape_cast %0 : vector<1x8x32xf32> to vector<8x32xf32>
    %c0_2 = arith.constant 0 : index
    %c0_3 = arith.constant 0 : index
    %c0_4 = arith.constant 0 : index
    %2 = vector.load %arg3[%c0_2, %c0_3, %c0_4] : memref<1x8x32xf32, #tpu.memory_space<vmem>>, vector<1x8x32xf32>
    %3 = vector.shape_cast %2 : vector<1x8x32xf32> to vector<8x32xf32>
    %c0_5 = arith.constant 0 : index
    %c0_6 = arith.constant 0 : index
    %c0_7 = arith.constant 0 : index
    %4 = vector.load %arg4[%c0_5, %c0_6, %c0_7] : memref<1x8x32xf32, #tpu.memory_space<vmem>>, vector<1x8x32xf32>
    %5 = vector.shape_cast %4 : vector<1x8x32xf32> to vector<8x32xf32>
    %c0_8 = arith.constant 0 : index
    %c0_9 = arith.constant 0 : index
    %6 = vector.load %arg5[%c0_8, %c0_9] : memref<32x32xf32, #tpu.memory_space<vmem>>, vector<32x32xf32>
    %cst = arith.constant dense<0.000000e+00> : vector<8x32xf32>
    %7 = tpu.matmul %1, %6, %cst {dimension_numbers = #tpu.dot_dimension_numbers<[1], [0], [0], [1], [0, 0, 1, 1], [], []>} : vector<8x32xf32>, vector<32x32xf32>, vector<8x32xf32> -> vector<8x32xf32>
    %c0_10 = arith.constant 0 : index
    %c0_11 = arith.constant 0 : index
    %8 = vector.load %arg6[%c0_10, %c0_11] : memref<1x32xf32, #tpu.memory_space<vmem>>, vector<1x32xf32>
    %9 = vector.broadcast %8 : vector<1x32xf32> to vector<8x32xf32>
    %10 = arith.addf %7, %9 : vector<8x32xf32>
    %c0_12 = arith.constant 0 : index
    %c0_13 = arith.constant 0 : index
    %11 = vector.load %arg7[%c0_12, %c0_13] : memref<32x32xf32, #tpu.memory_space<vmem>>, vector<32x32xf32>
    %cst_14 = arith.constant dense<0.000000e+00> : vector<8x32xf32>
    %12 = tpu.matmul %3, %11, %cst_14 {dimension_numbers = #tpu.dot_dimension_numbers<[1], [0], [0], [1], [0, 0, 1, 1], [], []>} : vector<8x32xf32>, vector<32x32xf32>, vector<8x32xf32> -> vector<8x32xf32>
    %c0_15 = arith.constant 0 : index
    %c0_16 = arith.constant 0 : index
    %13 = vector.load %arg8[%c0_15, %c0_16] : memref<1x32xf32, #tpu.memory_space<vmem>>, vector<1x32xf32>
    %14 = vector.broadcast %13 : vector<1x32xf32> to vector<8x32xf32>
    %15 = arith.addf %12, %14 : vector<8x32xf32>
    %c0_17 = arith.constant 0 : index
    %c0_18 = arith.constant 0 : index
    %16 = vector.load %arg9[%c0_17, %c0_18] : memref<32x32xf32, #tpu.memory_space<vmem>>, vector<32x32xf32>
    %cst_19 = arith.constant dense<0.000000e+00> : vector<8x32xf32>
    %17 = tpu.matmul %5, %16, %cst_19 {dimension_numbers = #tpu.dot_dimension_numbers<[1], [0], [0], [1], [0, 0, 1, 1], [], []>} : vector<8x32xf32>, vector<32x32xf32>, vector<8x32xf32> -> vector<8x32xf32>
    %c0_20 = arith.constant 0 : index
    %c0_21 = arith.constant 0 : index
    %18 = vector.load %arg10[%c0_20, %c0_21] : memref<1x32xf32, #tpu.memory_space<vmem>>, vector<1x32xf32>
    %19 = vector.broadcast %18 : vector<1x32xf32> to vector<8x32xf32>
    %20 = arith.addf %17, %19 : vector<8x32xf32>
    %21 = vector.extract_strided_slice %10 {offsets = [0, 0], sizes = [8, 8], strides = [1, 1]} : vector<8x32xf32> to vector<8x8xf32>
    %22 = vector.extract_strided_slice %10 {offsets = [0, 8], sizes = [8, 8], strides = [1, 1]} : vector<8x32xf32> to vector<8x8xf32>
    %23 = vector.extract_strided_slice %10 {offsets = [0, 16], sizes = [8, 8], strides = [1, 1]} : vector<8x32xf32> to vector<8x8xf32>
    %24 = vector.extract_strided_slice %10 {offsets = [0, 24], sizes = [8, 8], strides = [1, 1]} : vector<8x32xf32> to vector<8x8xf32>
    %25 = vector.shape_cast %21 : vector<8x8xf32> to vector<1x8x8xf32>
    %26 = vector.shape_cast %22 : vector<8x8xf32> to vector<1x8x8xf32>
    %27 = vector.shape_cast %23 : vector<8x8xf32> to vector<1x8x8xf32>
    %28 = vector.shape_cast %24 : vector<8x8xf32> to vector<1x8x8xf32>
    %29 = tpu.concatenate %25, %26, %27, %28 in 0 : vector<1x8x8xf32>, vector<1x8x8xf32>, vector<1x8x8xf32>, vector<1x8x8xf32> -> vector<4x8x8xf32>
    %30 = vector.extract_strided_slice %15 {offsets = [0, 0], sizes = [8, 8], strides = [1, 1]} : vector<8x32xf32> to vector<8x8xf32>
    %31 = vector.extract_strided_slice %15 {offsets = [0, 8], sizes = [8, 8], strides = [1, 1]} : vector<8x32xf32> to vector<8x8xf32>
    %32 = vector.extract_strided_slice %15 {offsets = [0, 16], sizes = [8, 8], strides = [1, 1]} : vector<8x32xf32> to vector<8x8xf32>
    %33 = vector.extract_strided_slice %15 {offsets = [0, 24], sizes = [8, 8], strides = [1, 1]} : vector<8x32xf32> to vector<8x8xf32>
    %34 = vector.shape_cast %30 : vector<8x8xf32> to vector<1x8x8xf32>
    %35 = vector.shape_cast %31 : vector<8x8xf32> to vector<1x8x8xf32>
    %36 = vector.shape_cast %32 : vector<8x8xf32> to vector<1x8x8xf32>
    %37 = vector.shape_cast %33 : vector<8x8xf32> to vector<1x8x8xf32>
    %38 = tpu.concatenate %34, %35, %36, %37 in 0 : vector<1x8x8xf32>, vector<1x8x8xf32>, vector<1x8x8xf32>, vector<1x8x8xf32> -> vector<4x8x8xf32>
    %39 = vector.extract_strided_slice %20 {offsets = [0, 0], sizes = [8, 8], strides = [1, 1]} : vector<8x32xf32> to vector<8x8xf32>
    %40 = vector.extract_strided_slice %20 {offsets = [0, 8], sizes = [8, 8], strides = [1, 1]} : vector<8x32xf32> to vector<8x8xf32>
    %41 = vector.extract_strided_slice %20 {offsets = [0, 16], sizes = [8, 8], strides = [1, 1]} : vector<8x32xf32> to vector<8x8xf32>
    %42 = vector.extract_strided_slice %20 {offsets = [0, 24], sizes = [8, 8], strides = [1, 1]} : vector<8x32xf32> to vector<8x8xf32>
    %43 = vector.shape_cast %39 : vector<8x8xf32> to vector<1x8x8xf32>
    %44 = vector.shape_cast %40 : vector<8x8xf32> to vector<1x8x8xf32>
    %45 = vector.shape_cast %41 : vector<8x8xf32> to vector<1x8x8xf32>
    %46 = vector.shape_cast %42 : vector<8x8xf32> to vector<1x8x8xf32>
    %47 = tpu.concatenate %43, %44, %45, %46 in 0 : vector<1x8x8xf32>, vector<1x8x8xf32>, vector<1x8x8xf32>, vector<1x8x8xf32> -> vector<4x8x8xf32>
    "tpu.trace_start"() <{level = 10 : i32, message = "gqe,gke->gqk"}> : () -> ()
    %cst_22 = arith.constant dense<0.000000e+00> : vector<4x8x8xf32>
    %48 = tpu.matmul %29, %38, %cst_22 {dimension_numbers = #tpu.dot_dimension_numbers<[2], [2], [1], [1], [0, 0, 0, 1, 1, 1], [0], [0]>} : vector<4x8x8xf32>, vector<4x8x8xf32>, vector<4x8x8xf32> -> vector<4x8x8xf32>
    "tpu.trace_stop"() : () -> ()
    %cst_23 = arith.constant dense<0xFF800000> : vector<4x8xf32>
    %49 = vector.multi_reduction <maximumf>, %48, %cst_23 [2] : vector<4x8x8xf32> to vector<4x8xf32>
    %50 = vector.shape_cast %49 : vector<4x8xf32> to vector<4x8x1xf32>
    %51 = vector.broadcast %50 : vector<4x8x1xf32> to vector<4x8x8xf32>
    %52 = arith.subf %48, %51 : vector<4x8x8xf32>
    %53 = math.exp %52 : vector<4x8x8xf32>
    %cst_24 = arith.constant dense<0.000000e+00> : vector<4x8xf32>
    %54 = vector.multi_reduction <add>, %53, %cst_24 [2] : vector<4x8x8xf32> to vector<4x8xf32>
    %55 = vector.shape_cast %54 : vector<4x8xf32> to vector<4x8x1xf32>
    %56 = tpu.reciprocal %55 {approx = true} : vector<4x8x1xf32> -> vector<4x8x1xf32>
    %57 = vector.broadcast %56 : vector<4x8x1xf32> to vector<4x8x8xf32>
    %58 = arith.mulf %53, %57 : vector<4x8x8xf32>
    %59 = vector.shape_cast %58 : vector<4x8x8xf32> to vector<4x1x8x8xf32>
    %c0_25 = arith.constant 0 : index
    %c0_26 = arith.constant 0 : index
    %c0_27 = arith.constant 0 : index
    %c0_28 = arith.constant 0 : index
    %60 = vector.load %arg16[%c0_25, %c0_26, %c0_27, %c0_28] : memref<4x1x8x8xf32, #tpu.memory_space<vmem>>, vector<4x1x8x8xf32>
    tpu.vector_store %arg16[%c0_25, %c0_26, %c0_27, %c0_28], %59 {strides = array<i32>} : memref<4x1x8x8xf32, #tpu.memory_space<vmem>>, vector<4x1x8x8xf32>,
    "tpu.trace_start"() <{level = 10 : i32, message = "gqk,gke->gqe"}> : () -> ()
    %cst_29 = arith.constant dense<0.000000e+00> : vector<4x8x8xf32>
    %61 = tpu.matmul %58, %47, %cst_29 {dimension_numbers = #tpu.dot_dimension_numbers<[2], [1], [1], [2], [0, 0, 0, 1, 1, 2], [0], [0]>} : vector<4x8x8xf32>, vector<4x8x8xf32>, vector<4x8x8xf32> -> vector<4x8x8xf32>
    "tpu.trace_stop"() : () -> ()
    %62 = vector.shape_cast %61 : vector<4x8x8xf32> to vector<4x1x8x8xf32>
    %63 = vector.extract_strided_slice %62 {offsets = [0, 0, 0, 0], sizes = [1, 1, 8, 8], strides = [1, 1, 1, 1]} : vector<4x1x8x8xf32> to vector<1x1x8x8xf32>
    %64 = vector.shape_cast %63 : vector<1x1x8x8xf32> to vector<1x8x8xf32>
    %65 = vector.shape_cast %64 : vector<1x8x8xf32> to vector<8x8xf32>
    %66 = vector.extract_strided_slice %62 {offsets = [1, 0, 0, 0], sizes = [1, 1, 8, 8], strides = [1, 1, 1, 1]} : vector<4x1x8x8xf32> to vector<1x1x8x8xf32>
    %67 = vector.shape_cast %66 : vector<1x1x8x8xf32> to vector<1x8x8xf32>
    %68 = vector.shape_cast %67 : vector<1x8x8xf32> to vector<8x8xf32>
    %69 = vector.extract_strided_slice %62 {offsets = [2, 0, 0, 0], sizes = [1, 1, 8, 8], strides = [1, 1, 1, 1]} : vector<4x1x8x8xf32> to vector<1x1x8x8xf32>
    %70 = vector.shape_cast %69 : vector<1x1x8x8xf32> to vector<1x8x8xf32>
    %71 = vector.shape_cast %70 : vector<1x8x8xf32> to vector<8x8xf32>
    %72 = vector.extract_strided_slice %62 {offsets = [3, 0, 0, 0], sizes = [1, 1, 8, 8], strides = [1, 1, 1, 1]} : vector<4x1x8x8xf32> to vector<1x1x8x8xf32>
    %73 = vector.shape_cast %72 : vector<1x1x8x8xf32> to vector<1x8x8xf32>
    %74 = vector.shape_cast %73 : vector<1x8x8xf32> to vector<8x8xf32>
    %75 = tpu.concatenate %65, %68, %71, %74 in 1 : vector<8x8xf32>, vector<8x8xf32>, vector<8x8xf32>, vector<8x8xf32> -> vector<8x32xf32>
    %c0_30 = arith.constant 0 : index
    %c0_31 = arith.constant 0 : index
    %76 = vector.load %arg11[%c0_30, %c0_31] : memref<32x32xf32, #tpu.memory_space<vmem>>, vector<32x32xf32>
    %cst_32 = arith.constant dense<0.000000e+00> : vector<8x32xf32>
    %77 = tpu.matmul %75, %76, %cst_32 {dimension_numbers = #tpu.dot_dimension_numbers<[1], [0], [0], [1], [0, 0, 1, 1], [], []>} : vector<8x32xf32>, vector<32x32xf32>, vector<8x32xf32> -> vector<8x32xf32>
    %c0_33 = arith.constant 0 : index
    %c0_34 = arith.constant 0 : index
    %78 = vector.load %arg12[%c0_33, %c0_34] : memref<1x32xf32, #tpu.memory_space<vmem>>, vector<1x32xf32>
    %79 = vector.broadcast %78 : vector<1x32xf32> to vector<8x32xf32>
    %80 = arith.addf %77, %79 : vector<8x32xf32>
    %81 = arith.addf %80, %1 : vector<8x32xf32>
    %cst_35 = arith.constant dense<0.000000e+00> : vector<8xf32>
    %82 = vector.multi_reduction <add>, %81, %cst_35 [1] : vector<8x32xf32> to vector<8xf32>
    %83 = vector.shape_cast %82 : vector<8xf32> to vector<8x1xf32>
    %cst_36 = arith.constant 3.200000e+01 : f32
    %84 = vector.broadcast %cst_36 : f32 to vector<8x1xf32>
    %85 = arith.divf %83, %84 : vector<8x1xf32>
    %86 = vector.broadcast %85 : vector<8x1xf32> to vector<8x32xf32>
    %87 = arith.subf %81, %86 : vector<8x32xf32>
    %88 = arith.mulf %87, %87 : vector<8x32xf32>
    %cst_37 = arith.constant dense<0.000000e+00> : vector<8xf32>
    %89 = vector.multi_reduction <add>, %88, %cst_37 [1] : vector<8x32xf32> to vector<8xf32>
    %90 = vector.shape_cast %89 : vector<8xf32> to vector<8x1xf32>
    %cst_38 = arith.constant 3.200000e+01 : f32
    %91 = vector.broadcast %cst_38 : f32 to vector<8x1xf32>
    %92 = arith.divf %90, %91 : vector<8x1xf32>
    %93 = vector.broadcast %85 : vector<8x1xf32> to vector<8x32xf32>
    %94 = arith.subf %81, %93 : vector<8x32xf32>
    %cst_39 = arith.constant 9.99999974E-6 : f32
    %95 = vector.broadcast %cst_39 : f32 to vector<8x1xf32>
    %96 = arith.addf %92, %95 : vector<8x1xf32>
    %97 = math.rsqrt %96 : vector<8x1xf32>
    %98 = vector.broadcast %97 : vector<8x1xf32> to vector<8x32xf32>
    %99 = arith.mulf %94, %98 : vector<8x32xf32>
    %c0_40 = arith.constant 0 : index
    %c0_41 = arith.constant 0 : index
    %100 = vector.load %arg13[%c0_40, %c0_41] : memref<1x32xf32, #tpu.memory_space<vmem>>, vector<1x32xf32>
    %101 = vector.broadcast %100 : vector<1x32xf32> to vector<8x32xf32>
    %102 = arith.mulf %99, %101 : vector<8x32xf32>
    %c0_42 = arith.constant 0 : index
    %c0_43 = arith.constant 0 : index
    %103 = vector.load %arg14[%c0_42, %c0_43] : memref<1x32xf32, #tpu.memory_space<vmem>>, vector<1x32xf32>
    %104 = vector.broadcast %103 : vector<1x32xf32> to vector<8x32xf32>
    %105 = arith.addf %102, %104 : vector<8x32xf32>
    %106 = vector.shape_cast %105 : vector<8x32xf32> to vector<1x8x32xf32>
    %c0_44 = arith.constant 0 : index
    %c0_45 = arith.constant 0 : index
    %c0_46 = arith.constant 0 : index
    %107 = vector.load %arg15[%c0_44, %c0_45, %c0_46] : memref<1x8x32xf32, #tpu.memory_space<vmem>>, vector<1x8x32xf32>
    tpu.vector_store %arg15[%c0_44, %c0_45, %c0_46], %106 {strides = array<i32>} : memref<1x8x32xf32, #tpu.memory_space<vmem>>, vector<1x8x32xf32>,
    return
  }
  func.func @transform_0(%arg0: i32, %arg1: i32) -> (i32, i32, i32) {
    %c0_i32 = arith.constant 0 : i32
    %c0_i32_0 = arith.constant 0 : i32
    return %arg0, %arg1, %c0_i32 : i32, i32, i32
  }
  func.func @transform_1(%arg0: i32, %arg1: i32) -> (i32, i32, i32) {
    %c0_i32 = arith.constant 0 : i32
    %c0_i32_0 = arith.constant 0 : i32
    %c0_i32_1 = arith.constant 0 : i32
    return %arg0, %c0_i32, %c0_i32_0 : i32, i32, i32
  }
  func.func @transform_2(%arg0: i32, %arg1: i32) -> (i32, i32, i32) {
    %c0_i32 = arith.constant 0 : i32
    %c0_i32_0 = arith.constant 0 : i32
    %c0_i32_1 = arith.constant 0 : i32
    return %arg0, %c0_i32, %c0_i32_0 : i32, i32, i32
  }
  func.func @transform_3(%arg0: i32, %arg1: i32) -> (i32, i32) {
    %c0_i32 = arith.constant 0 : i32
    %c0_i32_0 = arith.constant 0 : i32
    %c0_i32_1 = arith.constant 0 : i32
    return %c0_i32, %c0_i32_0 : i32, i32
  }
  func.func @transform_4(%arg0: i32, %arg1: i32) -> (i32, i32) {
    %c0_i32 = arith.constant 0 : i32
    %c0_i32_0 = arith.constant 0 : i32
    %c0_i32_1 = arith.constant 0 : i32
    return %c0_i32, %c0_i32_0 : i32, i32
  }
  func.func @transform_5(%arg0: i32, %arg1: i32) -> (i32, i32) {
    %c0_i32 = arith.constant 0 : i32
    %c0_i32_0 = arith.constant 0 : i32
    %c0_i32_1 = arith.constant 0 : i32
    return %c0_i32, %c0_i32_0 : i32, i32
  }
  func.func @transform_6(%arg0: i32, %arg1: i32) -> (i32, i32) {
    %c0_i32 = arith.constant 0 : i32
    %c0_i32_0 = arith.constant 0 : i32
    %c0_i32_1 = arith.constant 0 : i32
    return %c0_i32, %c0_i32_0 : i32, i32
  }
  func.func @transform_7(%arg0: i32, %arg1: i32) -> (i32, i32) {
    %c0_i32 = arith.constant 0 : i32
    %c0_i32_0 = arith.constant 0 : i32
    %c0_i32_1 = arith.constant 0 : i32
    return %c0_i32, %c0_i32_0 : i32, i32
  }
  func.func @transform_8(%arg0: i32, %arg1: i32) -> (i32, i32) {
    %c0_i32 = arith.constant 0 : i32
    %c0_i32_0 = arith.constant 0 : i32
    %c0_i32_1 = arith.constant 0 : i32
    return %c0_i32, %c0_i32_0 : i32, i32
  }
  func.func @transform_9(%arg0: i32, %arg1: i32) -> (i32, i32) {
    %c0_i32 = arith.constant 0 : i32
    %c0_i32_0 = arith.constant 0 : i32
    %c0_i32_1 = arith.constant 0 : i32
    return %c0_i32, %c0_i32_0 : i32, i32
  }
  func.func @transform_10(%arg0: i32, %arg1: i32) -> (i32, i32) {
    %c0_i32 = arith.constant 0 : i32
    %c0_i32_0 = arith.constant 0 : i32
    %c0_i32_1 = arith.constant 0 : i32
    return %c0_i32, %c0_i32_0 : i32, i32
  }
  func.func @transform_11(%arg0: i32, %arg1: i32) -> (i32, i32) {
    %c0_i32 = arith.constant 0 : i32
    %c0_i32_0 = arith.constant 0 : i32
    %c0_i32_1 = arith.constant 0 : i32
    return %c0_i32, %c0_i32_0 : i32, i32
  }
  func.func @transform_12(%arg0: i32, %arg1: i32) -> (i32, i32) {
    %c0_i32 = arith.constant 0 : i32
    %c0_i32_0 = arith.constant 0 : i32
    %c0_i32_1 = arith.constant 0 : i32
    return %c0_i32, %c0_i32_0 : i32, i32
  }
  func.func @transform_13(%arg0: i32, %arg1: i32) -> (i32, i32, i32) {
    %c0_i32 = arith.constant 0 : i32
    %c0_i32_0 = arith.constant 0 : i32
    return %arg0, %arg1, %c0_i32 : i32, i32, i32
  }
  func.func @transform_14(%arg0: i32, %arg1: i32) -> (i32, i32, i32, i32) {
    %c0_i32 = arith.constant 0 : i32
    %c0_i32_0 = arith.constant 0 : i32
    %c0_i32_1 = arith.constant 0 : i32
    return %c0_i32, %arg0, %arg1, %c0_i32_0 : i32, i32, i32, i32
  }
}

</mosaic_0001>

<bundles_post_ra>
// kernel: tpu_custom_call.1
= control target key start
LH: loop header
LB: loop body
LE: loop exit
PB: predicated region body
PF: predicated region fallthrough
CT: control target
= control target key end

     0   :  { %s3234_s0 = inlined_call_operand.hbm [shape: f32[2,8,32], index: 0, kind: input, shape index: {}]   ;;  %s3235_s1 = inlined_call_operand.hbm [shape: f32[2,8,32], index: 1, kind: input, shape index: {}]   ;;  %s3236_s2 = inlined_call_operand.hbm [shape: f32[2,8,32], index: 2, kind: input, shape index: {}]   ;;  %s3237_s3 = inlined_call_operand.hbm [shape: f32[32,32], index: 3, kind: input, shape index: {}]   ;;  %s3238_s4 = inlined_call_operand.vmem [shape: f32[1,32], index: 4, kind: input, shape index: {}]   ;;  %s3239_s5 = inlined_call_operand.hbm [shape: f32[32,32], index: 5, kind: input, shape index: {}]   ;;  %s3240_s6 = inlined_call_operand.vmem [shape: f32[1,32], index: 6, kind: input, shape index: {}]   ;;  %s3241_s7 = inlined_call_operand.hbm [shape: f32[32,32], index: 7, kind: input, shape index: {}]   ;;  %s3242_s8 = inlined_call_operand.hbm [shape: f32[1,32], index: 8, kind: input, shape index: {}]   ;;  %s3243_s9 = inlined_call_operand.vmem [shape: f32[32,32], index: 9, kind: input, shape index: {}]   ;;  %s3244_s10 = inlined_call_operand.vmem [shape: f32[1,32], index: 10, kind: input, shape index: {}]   ;;  %s3245_s11 = inlined_call_operand.vmem [shape: f32[1,32], index: 11, kind: input, shape index: {}]   ;;  %s3246_s12 = inlined_call_operand.vmem [shape: f32[1,32], index: 12, kind: input, shape index: {}]   ;;  %s3247_s13 = inlined_call_operand.hbm [shape: f32[2,8,32], index: 13, kind: output, shape index: {0}]   ;;  %s3248_s14 = inlined_call_operand.hbm [shape: f32[4,2,8,8], index: 14, kind: output, shape index: {1}]  }
   0x1   :  { %3276 = sst [smem:[#allocation31_spill]] %s3235_s1 }
   0x2   :  { %3277 = sst [smem:[#allocation32_spill]] %s3237_s3 }
   0x3   :  { %3278 = sst [smem:[#allocation33_spill]] %s3241_s7 }
   0x4   :  { %3279 = sst [smem:[#allocation34_spill]] %s3243_s9 }
   0x5   :  { %3280 = sst [smem:[#allocation35_spill]] %s3244_s10 }
   0x6   :  { %3281 = sst [smem:[#allocation36_spill]] %s3245_s11 }
   0x7   :  { %3282 = sst [smem:[#allocation37_spill]] %s3246_s12 }
   0x8   :  { %3283 = sst [smem:[#allocation38_spill]] %s3247_s13 }
   0x9   :  { %3284 = sst [smem:[#allocation39_spill]] %s3248_s14 }
   0xa   :  { %20 = vsyncpa [#allocation3], 0 }
   0xb   :  { %22 = vsyncpa [#allocation3 + $0x1], 0 }
   0xc   :  { %23 = vsyncpa [#allocation6], 0 }
   0xd   :  { %25 = vsyncpa [#allocation6 + $0x1], 0 }
   0xe   :  { %26 = vsyncpa [#allocation9], 0 }
   0xf   :  { %27 = vsyncpa [#allocation12], 0 }
  0x10   :  { %28 = vsyncpa [#allocation4], 0 }
  0x11   :  { %30 = vsyncpa [#allocation4 + $0x1], 0 }
  0x12   :  { %31 = vsyncpa [#allocation16], 0 }
  0x13   :  { %33 = vsyncpa [#allocation16 + $0x1], 0  ;;  %s2692_s29 = smov 0   ;;  %s2694_s30 = smov 0  }
  0x14   :  { %s2696_s15 = smov 0   ;;  %s2698_s16 = smov 0  }
  0x15   :  { %s2700_s17 = smov 0   ;;  %s2702_s18 = smov 0  }
  0x16 LB: > { %3285 = sst [smem:[#allocation23_spill]] %s2573_s29  ;;  %s2723_s19 = sadd.s32 4294967295, %s2593_s18   ;;  %s2593_s18 = sphi %s2702_s18, %s39_s18   ;;  %s2589_s17 = sphi %s2700_s17, %s3336_s17   ;;  %s2585_s16 = sphi %s2698_s16, %s3335_s16   ;;  %s2581_s15 = sphi %s2696_s15, %s3339_s15   ;;  %s2577_s30 = sphi %s2694_s30, %s3338_s30   ;;  %s2573_s29 = sphi %s2692_s29, %s3337_s29  }
  0x17   : > { %3286 = sst [smem:[#allocation24_spill]] %s2585_s16  ;;  %p1922_p0 = scmp.ge.s32.totalorder %s2593_s18, 1 }
  0x18   : > { %3287 = sst [smem:[#allocation25_spill]] %s2589_s17  ;;  %p3260_p1 = scmp.eq.s32.totalorder %s2723_s19, 0 }
  0x19   : > { %3288 = sst [smem:[#allocation26_spill]] %s2593_s18  ;;  %p402_p2 = scmp.lt.s32.totalorder %s2593_s18, 3 }
  0x1a   : > { %s2595_s21 = smov [#allocation8]   ;;  %s2596_s24 = smov [#allocation11]  }
  0x1b   : > { %p2728_p3 = pnand %p1922_p0, %p402_p2  ;;  %s414_s22 = sshll.u32 %s2595_s21, 4  ;;  %s2732_s22 = int_to_ptr.vmem [resolvable:$true] %s414_s22 }
  0x1c   : > { %s446_s25 = sshll.u32 %s2596_s24, 4  ;;  %s3291_s3 = sld [smem:[#allocation32_spill]]  ;;  %s2743_s25 = int_to_ptr.vmem [resolvable:$true] %s446_s25 }
  0x1d   : > { %s3289_s20 = scalar_select %p2728_p3, 1, 0 }
  0x1e   : > { %p2142_p4 = pneg %p2728_p3 }
  0x20   : > { %p2739_p6 = pnand %p2142_p4, %p3260_p1 }
  0x22   : > { %s3290_s23 = scalar_select %p2739_p6, 1, 0 }
  0x23   : > { %s2265_s28 = scalar_lea.hbm %s3291_s3, 512  ;;  %p2753_p8 = pneg %p2739_p6 }
  0x24   : > { %p2266_p7 = scmp.ne.s32.totalorder %s3291_s3, %s2265_s28  ;;  %p2272_p11 = scmp.lt.u32.totalorder %s2265_s28, %s3291_s3 }
  0x25   : > { %s3292_s12 = scalar_select %p2753_p8, 1, 0 }
  0x26   : > { %p2268_p9 = pnand %p2753_p8, %p2266_p7 }
  0x28   : > { %p2269_p10 = pneg %p2268_p9 }
  0x2a   : > { %p2274_p12 = pnand %p2272_p11, %p2269_p10 }
  0x2c   : > { %2277 = shalt.err (!%p2274_p12)
}
  0x2d   : > { %s2278_s13 = scalar_lea.vmem %s2732_s22, 512  ;;  %p2286_p4 = scmp.lt.s32.totalorder %s2732_s22, %s2732_s22 }
  0x2e   : > { %p2279_p13 = scmp.ne.s32.totalorder %s2732_s22, %s2278_s13  ;;  %p2287_p5 = scmp.lt.s32.totalorder %s2278_s13, %s2278_s13 }
  0x30   : > { %p2281_p0 = pnand %p2279_p13, %p2753_p8  ;;  %p2288_p7 = por %p2287_p5, %p2286_p4 }
  0x32   : > { %p2282_p2 = pneg %p2281_p0 }
  0x34   : > { %p2289_p9 = pnand %p2288_p7, %p2282_p2 }
  0x36   : > { %2292 = shalt.err (!%p2289_p9)
}
  0x37   : > { %s3253_s26 = smov 128   ;;  %s3254_s11 = smov 8  }
  0x38   : > { %2145 = dma.hbm_to_vmem [thread:$0]  (!%p2739_p6), %s3291_s3, 512, %s2732_s22, [#allocation9], %s3253_s26, %s3253_s26, %s3254_s11  }
  0x39   : > { %s3293_s7 = sld [smem:[#allocation33_spill]] }
  0x3f   : > { %s2293_s13 = scalar_lea.hbm %s3293_s7, 512 }
  0x40   : > { %p2294_p5 = scmp.ne.s32.totalorder %s3293_s7, %s2293_s13  ;;  %p2300_p12 = scmp.lt.u32.totalorder %s2293_s13, %s3293_s7 }
  0x42   : > { %p2296_p10 = pnand %p2294_p5, %p2753_p8 }
  0x44   : > { %p2297_p11 = pneg %p2296_p10 }
  0x46   : > { %p2302_p13 = pnand %p2300_p12, %p2297_p11 }
  0x48   : > { %2305 = shalt.err (!%p2302_p13)
}
  0x49   : > { %s2306_s22 = scalar_lea.vmem %s2743_s25, 512  ;;  %p2314_p7 = scmp.lt.s32.totalorder %s2743_s25, %s2743_s25 }
  0x4a   : > { %p2307_p0 = scmp.ne.s32.totalorder %s2743_s25, %s2306_s22  ;;  %p2315_p9 = scmp.lt.s32.totalorder %s2306_s22, %s2306_s22 }
  0x4c   : > { %p2309_p2 = pnand %p2307_p0, %p2753_p8  ;;  %p2316_p5 = por %p2315_p9, %p2314_p7 }
  0x4e   : > { %p2310_p4 = pneg %p2309_p2 }
  0x50   : > { %p2317_p10 = pnand %p2316_p5, %p2310_p4 }
  0x52   : > { %2320 = shalt.err (!%p2317_p10)
}
  0x53   : > { %2151 = dma.hbm_to_vmem [thread:$0]  (!%p2739_p6), %s3293_s7, 512, %s2743_s25, [#allocation12], %s3253_s26, %s3253_s26, %s3254_s11  }
  0x54   : > { %s1921_s14 = sadd.s32 4294967294, %s2593_s18   ;;  %s51_s16 = sadd.s32 1, %s2589_s17 }
  0x55   : > { %p53_p11 = scmp.ge.s32.totalorder %s51_s16, 2  ;;  %s60_s27 = sadd.s32 1, %s2581_s15 }
  0x56   : > { %p67_p12 = scmp.ne.s32.totalorder %s2581_s15, %s2577_s30  ;;  %p68_p13 = scmp.eq.s32.totalorder %s2593_s18, 0 }
  0x57   : > { %s3341_s16 = smov (%p53_p11, %s51_s16), 0  ;;  %p73_p2 = scmp.ne.s32.totalorder %s2577_s30, %s2573_s29 }
  0x58   : > { %3294 = sst [smem:[#allocation27_spill]] %s3341_s16  ;;  %p2811_p0 = por %p68_p13, %p67_p12 }
  0x59   : > { %s55_s25 = ssub.s32 %s2589_s17, %s3341_s16  ;;  %p361_p4 = scmp.eq.s32.totalorder %s2723_s19, 1 }
  0x5a   : > { %p58_p7 = scmp.eq.s32.totalorder %s55_s25, 0  ;;  %p2822_p9 = por %p3260_p1, %p73_p2 }
  0x5b   : > { %p2826_p5 = por %p361_p4, %p67_p12  ;;  %p367_p10 = scmp.eq.s32.totalorder %s1921_s14, 1 }
  0x5c   : > { %s3296_s21 = scalar_select %p2822_p9, 1, 0 }
  0x5d   : > { %s3297_s24 = scalar_select %p2826_p5, 1, 0 }
  0x5e   : > { %s2831_s13 = scalar_select %p58_p7, %s2581_s15, %s60_s27  }
  0x5f   : > { %3298 = sst [smem:[#allocation28_spill]] %s3297_s24  ;;  %p2833_p11 = por %p367_p10, %p73_p2 }
  0x60   : > { %3299 = sst [smem:[#allocation29_spill]] %s2831_s13  ;;  %p2176_p13 = scmp.lt.s32.totalorder %s2593_s18, 2 }
  0x61   : > { %s3300_s22 = scalar_select %p2833_p11, 1, 0 }
  0x62   : > { %s3255_s9 = sand.u32 1, %s2581_s15   ;;  %s2840_s10 = sshll.u32 %s2589_s17, 7 }
  0x63   : > { %3301 = sst [smem:[#allocation30_spill]] %s3300_s22  ;;  %s2844_s25 = sshll.u32 %s3255_s9, 3 }
  0x64   : > { %p2848_p12 = pnand %p2176_p13, %p2811_p0  ;;  %s502_s14 = sand.u32 1, %s2593_s18  }
  0x65   : > { %s3303_s1 = sld [smem:[#allocation31_spill]]  ;;  %s506_s7 = scalar_lea.vmem [#allocation5], %s2844_s25 }
  0x66   : > { %s3302_s26 = scalar_select %p2848_p12, 1, 0 }
  0x67   : > { %s513_s9 = sshll.u32 %s506_s7, 4  ;;  %s2862_s28 = scalar_lea.sflag [#allocation6], %s502_s14  ;;  %s2860_s9 = int_to_ptr.vmem [resolvable:$true] %s513_s9 }
  0x68   : > { %p2868_p2 = pneg %p2848_p12 }
  0x6a   : > { %s3304_s17 = scalar_select %p2868_p2, 1, 0 }
  0x6b   : > { %s2857_s3 = scalar_lea.hbm %s3303_s1, %s2840_s10  ;;  %s2326_s13 = scalar_lea.hbm %s3303_s1, 256 }
  0x6c   : > { %s2321_s16 = scalar_lea.hbm %s2857_s3, 128  ;;  %p2327_p10 = scmp.lt.u32.totalorder %s2857_s3, %s3303_s1 }
  0x6d   : > { %p2322_p0 = scmp.ne.s32.totalorder %s2857_s3, %s2321_s16  ;;  %p2328_p13 = scmp.lt.u32.totalorder %s2326_s13, %s2321_s16 }
  0x6e   : > { %p2330_p11 = scmp.lt.u32.totalorder %s2321_s16, %s2857_s3 }
  0x6f   : > { %p2324_p4 = pnand %p2868_p2, %p2322_p0  ;;  %p2329_p1 = por %p2328_p13, %p2327_p10 }
  0x71   : > { %p2325_p7 = pneg %p2324_p4  ;;  %p2331_p5 = por %p2330_p11, %p2329_p1 }
  0x73   : > { %p2332_p9 = pnand %p2331_p5, %p2325_p7 }
  0x75   : > { %2335 = shalt.err (!%p2332_p9)
}
  0x76   : > { %s2336_s14 = scalar_lea.vmem %s2860_s9, 128  ;;  %s2599_s11 = smov [#allocation5]  }
  0x77   : > { %p2337_p0 = scmp.ne.s32.totalorder %s2860_s9, %s2336_s14  ;;  %s2341_s27 = sshll.u32 %s2599_s11, 4  ;;  %s2342_s27 = int_to_ptr.vmem [resolvable:$false] %s2341_s27 }
  0x78   : > { %s2343_s18 = scalar_lea.vmem %s2342_s27, 256  ;;  %p2344_p6 = scmp.lt.s32.totalorder %s2860_s9, %s2342_s27 }
  0x79   : > { %p2339_p4 = pnand %p2337_p0, %p2868_p2  ;;  %p2345_p8 = scmp.lt.s32.totalorder %s2343_s18, %s2336_s14 }
  0x7b   : > { %p2340_p3 = pneg %p2339_p4  ;;  %p2346_p10 = por %p2345_p8, %p2344_p6 }
  0x7d   : > { %p2347_p13 = pnand %p2346_p10, %p2340_p3 }
  0x7f   : > { %2350 = shalt.err (!%p2347_p13)
}
  0x80   : > { %2161 = dma.hbm_to_vmem [thread:$0]  (!%p2848_p12), %s2857_s3, 128, %s2860_s9, %s2862_s28  }
  0x81   : > { %s2600_s16 = smov [#allocation10]   ;;  %s2601_s7 = smov [#allocation13]  }
  0x82   : > { %s430_s13 = sshll.u32 %s2600_s16, 4  ;;  %s460_s1 = sshll.u32 %s2601_s7, 4  ;;  %s431_s13 = int_to_ptr.vmem [resolvable:$true] %s430_s13  ;;  %s461_s1 = int_to_ptr.vmem [resolvable:$true] %s460_s1 }
  0x83   : > { %s2351_s27 = scalar_lea.hbm %s3239_s5, 512  ;;  %p3305_p3 = scmp.ne.s32.totalorder %s3292_s12, 0 }
  0x84   : > { %p2352_p1 = scmp.ne.s32.totalorder %s3239_s5, %s2351_s27  ;;  %p2358_p9 = scmp.lt.u32.totalorder %s2351_s27, %s3239_s5 }
  0x86   : > { %p2354_p6 = pnand %p2352_p1, %p3305_p3 }
  0x88   : > { %p2355_p8 = pneg %p2354_p6 }
  0x8a   : > { %p2360_p5 = pnand %p2358_p9, %p2355_p8 }
  0x8c   : > { %2363 = shalt.err (!%p2360_p5)
}
  0x8d   : > { %s2364_s3 = scalar_lea.vmem %s431_s13, 512  ;;  %p2372_p4 = scmp.lt.s32.totalorder %s431_s13, %s431_s13 }
  0x8e   : > { %p2365_p11 = scmp.ne.s32.totalorder %s431_s13, %s2364_s3  ;;  %p2373_p10 = scmp.lt.s32.totalorder %s2364_s3, %s2364_s3 }
  0x90   : > { %p2367_p7 = pnand %p2365_p11, %p3305_p3  ;;  %p2374_p13 = por %p2373_p10, %p2372_p4 }
  0x92   : > { %p2368_p0 = pneg %p2367_p7 }
  0x94   : > { %p2375_p12 = pnand %p2374_p13, %p2368_p0 }
  0x96   : > { %2378 = shalt.err (!%p2375_p12)
}
  0x97   : > { %p3306_p1 = scmp.ne.s32.totalorder %s3290_s23, 0  ;;  %s3307_s22 = smov 8  }
  0x98   : > { %s3308_s9 = smov 128   ;;  %s2379_s11 = scalar_lea.hbm %s3242_s8, 16 }
  0x99   : > { %2148 = dma.hbm_to_vmem [thread:$0]  (!%p3306_p1), %s3239_s5, 512, %s431_s13, [#allocation9], %s3308_s9, %s3308_s9, %s3307_s22  }
  0x9a   : > { %p2380_p6 = scmp.ne.s32.totalorder %s3242_s8, %s2379_s11  ;;  %p2386_p9 = scmp.lt.u32.totalorder %s2379_s11, %s3242_s8 }
  0x9c   : > { %p2382_p12 = pnand %p2380_p6, %p3305_p3 }
  0x9e   : > { %p2383_p8 = pneg %p2382_p12 }
  0xa0   : > { %p2388_p5 = pnand %p2386_p9, %p2383_p8 }
  0xa2   : > { %2391 = shalt.err (!%p2388_p5)
}
  0xa3   : > { %s2392_s29 = scalar_lea.vmem %s461_s1, 16  ;;  %s2399_s13 = scalar_lea.vmem %s461_s1, 32 }
  0xa4   : > { %p2393_p11 = scmp.ne.s32.totalorder %s461_s1, %s2392_s29  ;;  %p2400_p4 = scmp.lt.s32.totalorder %s461_s1, %s461_s1 }
  0xa5   : > { %p2401_p10 = scmp.lt.s32.totalorder %s2399_s13, %s2392_s29 }
  0xa6   : > { %p2395_p7 = pnand %p2393_p11, %p3305_p3 }
  0xa7   : > { %p2402_p13 = por %p2401_p10, %p2400_p4 }
  0xa8   : > { %p2396_p0 = pneg %p2395_p7 }
  0xaa   : > { %p2403_p2 = pnand %p2402_p13, %p2396_p0 }
  0xac   : > { %2406 = shalt.err (!%p2403_p2)
}
  0xad   : > { %2154 = dma.hbm_to_vmem [thread:$0]  (!%p3306_p1), %s3242_s8, 16, %s461_s1, [#allocation12]  }
  0xae   : > { %s2935_s16 = scalar_lea.hbm %s3234_s0, %s2840_s10  ;;  %s487_s7 = scalar_lea.vmem [#allocation2], %s2844_s25 }
  0xaf   : > { %s495_s23 = sshll.u32 %s487_s7, 4  ;;  %s2944_s14 = scalar_lea.hbm %s3236_s2, %s2840_s10  ;;  %s2938_s23 = int_to_ptr.vmem [resolvable:$true] %s495_s23 }
  0xb0   : > { %s3309_s18 = sand.u32 1, %s2581_s15   ;;  %s2407_s3 = scalar_lea.hbm %s2935_s16, 128 }
  0xb1   : > { %s484_s1 = scalar_lea.sflag [#allocation3], %s3309_s18  ;;  %p2408_p2 = scmp.ne.s32.totalorder %s2935_s16, %s2407_s3 }
  0xb2   : > { %p3310_p3 = scmp.ne.s32.totalorder %s3304_s17, 0  ;;  %s2412_s22 = scalar_lea.hbm %s3234_s0, 256 }
  0xb3   : > { %p2413_p12 = scmp.lt.u32.totalorder %s2935_s16, %s3234_s0  ;;  %p2414_p8 = scmp.lt.u32.totalorder %s2412_s22, %s2407_s3 }
  0xb4   : > { %p2410_p1 = pnand %p2408_p2, %p3310_p3  ;;  %p2416_p5 = scmp.lt.u32.totalorder %s2407_s3, %s2935_s16 }
  0xb5   : > { %p2415_p9 = por %p2414_p8, %p2413_p12 }
  0xb6   : > { %p2411_p6 = pneg %p2410_p1 }
  0xb7   : > { %p2417_p11 = por %p2416_p5, %p2415_p9 }
  0xb9   : > { %p2418_p7 = pnand %p2417_p11, %p2411_p6 }
  0xbb   : > { %2421 = shalt.err (!%p2418_p7)
}
  0xbc   : > { %s2422_s10 = scalar_lea.vmem %s2938_s23, 128  ;;  %s2602_s24 = smov [#allocation2]  }
  0xbd   : > { %p2423_p0 = scmp.ne.s32.totalorder %s2938_s23, %s2422_s10  ;;  %s2427_s7 = sshll.u32 %s2602_s24, 4  ;;  %s2428_s7 = int_to_ptr.vmem [resolvable:$false] %s2427_s7 }
  0xbe   : > { %s2429_s11 = scalar_lea.vmem %s2428_s7, 256  ;;  %p2430_p13 = scmp.lt.s32.totalorder %s2938_s23, %s2428_s7 }
  0xbf   : > { %p2425_p4 = pnand %p2423_p0, %p3310_p3  ;;  %p2431_p2 = scmp.lt.s32.totalorder %s2429_s11, %s2422_s10 }
  0xc1   : > { %p2426_p10 = pneg %p2425_p4  ;;  %p2432_p1 = por %p2431_p2, %p2430_p13 }
  0xc3   : > { %p2433_p12 = pnand %p2432_p1, %p2426_p10 }
  0xc5   : > { %2436 = shalt.err (!%p2433_p12)
}
  0xc6   : > { %p3311_p6 = scmp.ne.s32.totalorder %s3302_s26, 0  ;;  %s524_s27 = scalar_lea.vmem [#allocation7], %s2844_s25 }
  0xc7   : > { %s531_s18 = sshll.u32 %s524_s27, 4  ;;  %s2437_s3 = scalar_lea.hbm %s2944_s14, 128  ;;  %s532_s18 = int_to_ptr.vmem [resolvable:$true] %s531_s18 }
  0xc8   : > { %2158 = dma.hbm_to_vmem [thread:$0]  (!%p3311_p6), %s2935_s16, 128, %s2938_s23, %s484_s1  }
  0xc9   : > { %p2438_p8 = scmp.ne.s32.totalorder %s2944_s14, %s2437_s3  ;;  %s2442_s22 = scalar_lea.hbm %s3236_s2, 256 }
  0xca   : > { %p2443_p11 = scmp.lt.u32.totalorder %s2944_s14, %s3236_s2  ;;  %p2444_p7 = scmp.lt.u32.totalorder %s2442_s22, %s2437_s3 }
  0xcb   : > { %p2440_p9 = pnand %p2438_p8, %p3310_p3  ;;  %p2446_p4 = scmp.lt.u32.totalorder %s2437_s3, %s2944_s14 }
  0xcc   : > { %p2445_p0 = por %p2444_p7, %p2443_p11 }
  0xcd   : > { %p2441_p5 = pneg %p2440_p9 }
  0xce   : > { %p2447_p10 = por %p2446_p4, %p2445_p0 }
  0xd0   : > { %p2448_p13 = pnand %p2447_p10, %p2441_p5 }
  0xd2   : > { %2451 = shalt.err (!%p2448_p13)
}
  0xd3   : > { %s2452_s25 = scalar_lea.vmem %s532_s18, 128  ;;  %s2603_s16 = smov [#allocation7]  }
  0xd4   : > { %p2453_p2 = scmp.ne.s32.totalorder %s532_s18, %s2452_s25  ;;  %s2457_s23 = sshll.u32 %s2603_s16, 4  ;;  %s2458_s23 = int_to_ptr.vmem [resolvable:$false] %s2457_s23 }
  0xd5   : > { %s2459_s1 = scalar_lea.vmem %s2458_s23, 256  ;;  %p2460_p8 = scmp.lt.s32.totalorder %s532_s18, %s2458_s23 }
  0xd6   : > { %p2455_p1 = pnand %p2453_p2, %p3310_p3  ;;  %p2461_p9 = scmp.lt.s32.totalorder %s2459_s1, %s2452_s25 }
  0xd8   : > { %p2456_p12 = pneg %p2455_p1  ;;  %p2462_p6 = por %p2461_p9, %p2460_p8 }
  0xda   : > { %p2463_p7 = pnand %p2462_p6, %p2456_p12 }
  0xdc   : > { %2466 = shalt.err (!%p2463_p7)
}
  0xdd   : > { %p3312_p11 = scmp.ne.s32.totalorder %s3302_s26, 0  ;;  %p3313_p5 = scmp.ne.s32.totalorder %s3289_s20, 0 }
  0xde   : > { %s2991_s17 = sand.u32 (!%p3313_p5), 1, %s2577_s30   ;;  %p3314_p3 = scmp.ne.s32.totalorder (!%p3313_p5), %s3296_s21, 0 }
  0xdf   : > { %2164 = dma.hbm_to_vmem [thread:$0]  (!%p3312_p11), %s2944_s14, 128, %s532_s18, %s2862_s28  }
  0xe0   : > { %540 = sbr.rel (%p3313_p5) target bundleno = 1992 (0x7c8), region = 72  ;;  %s2994_s10 = sshll.u32 (!%p3313_p5), %s2991_s17, 3 }
  0xe1   : > { %s543_s24 = scalar_lea.sflag (!%p3313_p5), [#allocation3], %s2991_s17  ;;  %s546_s7 = scalar_lea.vmem (!%p3313_p5), [#allocation2], %s2994_s10 }
  0xe7   : > { %2548 = dma.done.wait (%p3314_p3), %s543_s24, 128  }
  0xe8   : > { %2550 = vsyncadd (%p3314_p3), %s543_s24, 4294967168  ;;  %s551_s20 = sand.u32 1, %s2723_s19   ;;  %s555_s28 = scalar_lea.vmem [#allocation5], %s2994_s10 }
  0xe9   : > { %s552_s26 = scalar_lea.sflag [#allocation6], %s551_s20 }
  0xea   : > { %2552 = dma.done.wait (%p3314_p3), %s552_s26, 256  }
  0xeb   : > { %2554 = vsyncadd (%p3314_p3), %s552_s26, 4294967040  ;;  %s564_s14 = scalar_lea.vmem [#allocation7], %s2994_s10  ;;  %p3315_p6 = scmp.eq.s32.totalorder %s2723_s19, 0 }
  0xed   : > { %2556 = dma.done.wait (%p3315_p6), [#allocation9], 1024   ;;  %p3316_p0 = pmov %p3315_p6 }
  0xef   : > { %2558 = vsyncadd (%p3316_p0), [#allocation9], 4294966272  ;;  %p3317_p4 = pmov %p3316_p0 }
  0xf0   : > { %p3318_p10 = pmov %p3316_p0 }
  0xf1   : > { %2560 = dma.done.wait (%p3317_p4), [#allocation12], 528  }
  0xf2   : > { %2562 = vsyncadd (%p3318_p10), [#allocation12], 4294966768  ;;  %v2604_v0 = vmov 0.0|0.0   ;;  %vm2605_vm0 = vmmov 0   ;;  %v2606_v1 = vmov 0.0   ;;  %v728_v2 = vld [vmem:[#allocation10] sm:$0xff] }
  0xf3   : > { %2098 = vmatprep.subr.bf16.mxu1 %v2604_v0  ;;  %2092 = vmatprep.subr.bf16.mxu0 %v2604_v0  ;;  %v729_v3 = vld [vmem:[#allocation10 + $0x8] sm:$0xff]  ;;  %v643_v4 = vld [vmem:[#allocation8] sm:$0xff]  ;;  %v730_v7 = vld [vmem:[#allocation10 + $0x10] sm:$0xff]  ;;  %vm654_vm1 = vcmask 261120   ;;  %vm920_vm2 = vcmask 64512   ;;  %s2607_s18 = smov 112  }
  0xf4   : > { %2027 = vmatprep.mubr.msk.f32.mxu1 %vm2605_vm0, %v2606_v1  ;;  %2016 = vmatprep.mubr.msk.f32.mxu0 %vm2605_vm0, %v2606_v1  ;;  %v2099_v5 = vpack.c.bf16 %v729_v3, %v728_v2  ;;  %v644_v6 = vld [vmem:[#allocation8 + $0x8] sm:$0xff]  ;;  %v731_v8 = vld [vmem:[#allocation10 + $0x18] sm:$0xff]  ;;  %v645_v10 = vld [vmem:[#allocation8 + $0x10] sm:$0xff]  ;;  %s2608_s3 = smov 120   ;;  %s2609_s29 = smov 104   ;;  %vm1570_vm3 = vcmask 130048  }
  0xf5   : > { %v2093_v9 = vpack.c.bf16 %v644_v6, %v643_v4  ;;  %v646_v11 = vld [vmem:[#allocation8 + $0x18] sm:$0xff]  ;;  %v2102_v12 = vpack.c.bf16 %v731_v8, %v730_v7  ;;  %v641_v14 = vld [vmem:[%s555_s28] sm:$0xff]  ;;  %v1946_v16 = vld [vmem:[%s3240_s6] ss:$0 sm:$0xff]  ;;  %s1943_s13 = sshll.u32 %s2991_s17, 5  ;;  %s3319_s25 = sld [smem:[#allocation34_spill]] }
  0xf6   : > { %2100 = vmatpush3.bf16.msra.mxu1 %v2099_v5  ;;  %v2096_v13 = vpack.c.bf16 %v646_v11, %v645_v10  ;;  %v3029_v15 = vld [vmem:[%s546_s7] sm:$0xff]  ;;  %v812_v23 = vld [vmem:[#allocation11] sm:$0xff]  ;;  %v813_v24 = vld [vmem:[#allocation11 + $0x8] sm:$0xff]  ;;  %s3093_s22 = scalar_lea.vmem [#allocation15], %s1943_s13  ;;  %s2610_s26 = smov 8   ;;  %vm1572_vm4 = vcmask 195584  }
  0xf7   : > { %2094 = vmatpush3.bf16.msra.mxu0 %v2093_v9  ;;  %2101 = vmatprep.subr.bf16.mxu1 %v2604_v0  ;;  %v1944_v18 = vld [vmem:[%s3238_s4] ss:$0 sm:$0xff]  ;;  %v2105_v26 = vpack.c.bf16 %v813_v24, %v812_v23  ;;  %v815_v28 = vld [vmem:[#allocation11 + $0x18] sm:$0xff]  ;;  %v1948_v40 = vld [vmem:[#allocation13] ss:$0 sm:$0xff]  ;;  %s2611_s28 = smov 16  }
  0xf8   : > { %2095 = vmatprep.subr.bf16.mxu0 %v2604_v0  ;;  %v814_v27 = vld [vmem:[#allocation11 + $0x10] sm:$0xff]  ;;  %s3320_s19 = sld [smem:[#allocation24_spill]]  ;;  %s3321_s27 = sld [smem:[#allocation35_spill]] }
  0xf9   : > { %v2108_v29 = vpack.c.bf16 %v815_v28, %v814_v27  ;;  %v642_v30 = vld [vmem:[%s564_s14] sm:$0xff]  ;;  %s2612_s14 = smov 24   ;;  %s3323_s9 = sld [smem:[#allocation39_spill]] }
  0xfa   : > { %2103 = vmatpush3.bf16.msra.mxu1 %v2102_v12  ;;  %s1723_s16 = sshll.u32 %s3093_s22, 4  ;;  %s1696_s23 = scalar_lea.sflag [#allocation16], %s2991_s17  ;;  %s3145_s16 = int_to_ptr.vmem [resolvable:$true] %s1723_s16 }
  0xfb   : > { %2097 = vmatpush3.bf16.msra.mxu0 %v2096_v13  ;;  %2041 = vmatprep.subr.mxu1 %v2606_v1  ;;  %s2467_s1 = scalar_lea.vmem %s3145_s16, 512  ;;  %s2613_s24 = smov [#allocation15]  }
  0xfc   : > { %2104 = vmatprep.subr.bf16.mxu0 %v2604_v0  ;;  %p2468_p13 = scmp.ne.s32.totalorder %s3145_s16, %s2467_s1  ;;  %s2471_s7 = sshll.u32 %s2613_s24, 4  ;;  %s2472_s7 = int_to_ptr.vmem [resolvable:$false] %s2471_s7 }
  0xfd   : > { %2028 = vmatmul.mubr.msk.f32.vlgmr.msra.gmra.mrb[0].mxu1 %vm654_vm1, %v641_v14  ;;  %s2473_s20 = scalar_lea.vmem %s2472_s7, 1024  ;;  %p2474_p8 = scmp.lt.s32.totalorder %s3145_s16, %s2472_s7 }
  0xfe   : > { %2017 = vmatmul.mubr.msk.f32.vlgmr.msra.gmra.mrb[0].mxu0 %vm654_vm1, %v3029_v15  ;;  %2043 = vmatprep.mubr.msk.f32.mxu1 %vm2605_vm0, %v2606_v1  ;;  %p2475_p9 = scmp.lt.s32.totalorder %s2473_s20, %s2467_s1 }
  0xff   : > { %2038 = vmatprep.mubr.msk.f32.mxu0 %vm2605_vm0, %v2606_v1  ;;  %2106 = vmatpush3.bf16.msra.mxu0 %v2105_v26 }
 0x100   : > { %2107 = vmatprep.subr.bf16.mxu0 %v2604_v0  ;;  %p2476_p7 = por %p2475_p9, %p2474_p8 }
 0x103   : > { %2109 = vmatpush3.bf16.msra.mxu0 %v2108_v29  ;;  %v1574_v29 = vld [vmem:[%s3319_s25] sm:$0xff] }
 0x104   : > { %2061 = vmatprep.subr.mxu0 %v2606_v1 }
 0x106   : > { %2039 = vmatmul.mubr.msk.f32.vlgmr.msra.gmra.mrb[2].mxu0 %vm654_vm1, %v642_v30  ;;  %v1575_v30 = vld [vmem:[%s3319_s25 + $0x8] sm:$0xff] }
 0x107   : > { %2063 = vmatprep.mubr.msk.f32.mxu0 %vm2605_vm0, %v2606_v1 }
 0x1d0   : > { %v808_v17 = vpop.f32.mrb[0].mxu1 }
 0x1d1   : > { %v809_v19 = vadd.f32 %v1946_v16, %v808_v17  ;;  %v2029_v20 = vpop.f32.mrb[1].mxu1  ;;  %v724_v21 = vpop.f32.mrb[0].mxu0 }
 0x1d2   : > { %v2018_v22 = vpop.f32.mrb[1].mxu0  ;;  %v725_v25 = vadd.f32 %v1944_v18, %v724_v21 }
 0x1d3   : > { %906 = vrot.lane.b32.xlu1 %v809_v19, %s2607_s18  ;;  %904 = vrot.lane.b32.xlu0 %v809_v19, %s2608_s3 }
 0x1d4   : > { %2042 = vmatpush3.xpose.msk.msra.mxu1 %vm920_vm2, %v809_v19 }
 0x1d5   : > { %2046 = vmatprep.subr.mxu1 %v2606_v1 }
 0x1d7   : > { %2044 = vmatmul.mubr.msk.f32.vlgmr.msra.gmra.mrb[2].mxu1 %vm920_vm2, %v725_v25  ;;  %899 = vrot.lane.b32.xlu1 %v725_v25, %s2607_s18 }
 0x1d8   : > { %897 = vrot.lane.b32.xlu0 %v725_v25, %s2608_s3  ;;  %2048 = vmatprep.mubr.msk.f32.mxu1 %vm2605_vm0, %v2606_v1 }
 0x1d9   : > { %v892_v41 = vpop.f32.mrb[2].mxu0 }
 0x1da   : > { %v893_v42 = vadd.f32 %v1948_v40, %v892_v41  ;;  %v2040_v43 = vpop.f32.mrb[3].mxu0 }
 0x1db   : > { %901 = vrot.lane.b32.xlu1 %v725_v25, %s2609_s29 }
 0x1dc   : > { %908 = vrot.lane.b32.xlu0 %v809_v19, %s2609_s29  ;;  %2062 = vmatpush3.msra.mxu0 %v893_v42 }
 0x1dd   : > { %2071 = vmatprep.subr.mxu0 %v2606_v1 }
 0x245   : > { %v905_v31 = vpop.permute.xlu0 %904  ;;  %v907_v32 = vpop.permute.xlu1 %906 }
 0x246   : > { %2047 = vmatpush3.xpose.msk.msra.mxu1 %vm920_vm2, %v905_v31  ;;  %v2111_v31 = vpack.c.bf16 %v1575_v30, %v1574_v29 }
 0x247   : > { %2051 = vmatprep.subr.mxu1 %v2606_v1 }
 0x249   : > { %v900_v34 = vpop.permute.xlu1 %899 }
 0x24a   : > { %v898_v33 = vpop.permute.xlu0 %897 }
 0x24b   : > { %2049 = vmatmul.mubr.msk.f32.vlgmr.msra.gmra.mrb[4].mxu1 %vm920_vm2, %v898_v33 }
 0x24c   : > { %2052 = vmatpush3.xpose.msk.msra.mxu1 %vm920_vm2, %v907_v32  ;;  %2053 = vmatprep.mubr.msk.f32.mxu1 %vm2605_vm0, %v2606_v1  ;;  %v1577_v32 = vld [vmem:[%s3319_s25 + $0x18] sm:$0xff] }
 0x24d   : > { %2056 = vmatprep.subr.mxu1 %v2606_v1  ;;  %v902_v36 = vpop.permute.xlu1 %901 }
 0x24e   : > { %v909_v35 = vpop.permute.xlu0 %908 }
 0x24f   : > { %2054 = vmatmul.mubr.msk.f32.vlgmr.msra.gmra.mrb[6].mxu1 %vm920_vm2, %v900_v34 }
 0x250   : > { %2057 = vmatpush3.xpose.msk.msra.mxu1 %vm920_vm2, %v909_v35  ;;  %2058 = vmatprep.mubr.msk.f32.mxu1 %vm2605_vm0, %v2606_v1 }
 0x251   : > { %2066 = vmatprep.subr.mxu1 %v2606_v1 }
 0x253   : > { %2059 = vmatmul.mubr.msk.f32.vlgmr.msra.gmra.mrb[8].mxu1 %vm920_vm2, %v902_v36 }
 0x254   : > { %2068 = vmatprep.mubr.msk.f32.mxu1 %vm2605_vm0, %v2606_v1 }
 0x2aa   : > { %v991_v37 = vpop.f32.mrb[2].mxu1 }
 0x2ab   : > { %v2045_v38 = vpop.f32.mrb[3].mxu1  ;;  %v1217_v39 = vsel %vm920_vm2, %v991_v37, -inf }
 0x2ac   : > { %1218 = vmax.xlane.f32.xlu0 %v1217_v39 }
 0x31e   : > { %v1065_v44 = vpop.f32.mrb[4].mxu1 }
 0x31f   : > { %v2050_v45 = vpop.f32.mrb[5].mxu1  ;;  %v1220_v46 = vsel %vm920_vm2, %v1065_v44, -inf }
 0x320   : > { %1221 = vmax.xlane.f32.xlu1 %v1220_v46  ;;  %v1962_v45 = vld [vmem:[%s3321_s27] ss:$0 sm:$0xff] }
 0x322   : > { %v1139_v47 = vpop.f32.mrb[6].mxu1 }
 0x323   : > { %v2055_v48 = vpop.f32.mrb[7].mxu1  ;;  %v1223_v49 = vsel %vm920_vm2, %v1139_v47, -inf }
 0x324   : > { %1224 = vmax.xlane.f32.xlu0 %v1223_v49 }
 0x326   : > { %v1213_v50 = vpop.f32.mrb[8].mxu1 }
 0x327   : > { %v2060_v51 = vpop.f32.mrb[9].mxu1  ;;  %v1226_v52 = vsel %vm920_vm2, %v1213_v50, -inf }
 0x328   : > { %1227 = vmax.xlane.f32.xlu0 %v1226_v52 }
 0x331   : > { %911 = vrot.lane.b32.xlu1 %v893_v42, %s2608_s3  ;;  %s1968_s3 = sshll.u32 %s3320_s19, 7 }
 0x332   : > { %s3142_s12 = scalar_lea.hbm %s3323_s9, %s1968_s3 }
 0x339   : > { %v1219_v53 = vpop.xlane.xlu0 %1218 }
 0x33a   : > { %v1229_v54 = vsub.f32 %v991_v37, %v1219_v53 }
 0x33c   : > { %v1233_v55 = vmul.f32 1.442695, %v1229_v54 }
 0x33e   : > { %2247 = vpow2.f32 %v1233_v55 }
 0x348   : > { %v2248_v56 = vpop.eup %2247 }
 0x349   : > { %v1241_v57 = vsel %vm920_vm2, %v2248_v56, 0.0 }
 0x355   : > { %1242 = vadd.xlane.f32.xlu1 %v1241_v57 }
 0x3ad   : > { %v1222_v58 = vpop.xlane.xlu1 %1221 }
 0x3ae   : > { %v1230_v59 = vsub.f32 %v1065_v44, %v1222_v58 }
 0x3b0   : > { %v1235_v60 = vmul.f32 1.442695, %v1230_v59 }
 0x3b1   : > { %v1225_v61 = vpop.xlane.xlu0 %1224  ;;  %v912_v62 = vpop.permute.xlu1 %911 }
 0x3b2   : > { %2249 = vpow2.f32 %v1235_v60  ;;  %v1231_v63 = vsub.f32 %v1139_v47, %v1225_v61  ;;  %2067 = vmatpush3.msra.mxu1 %v912_v62 }
 0x3b3   : > { %2076 = vmatprep.subr.mxu1 %v2606_v1 }
 0x3b4   : > { %v1237_v2 = vmul.f32 1.442695, %v1231_v63 }
 0x3b5   : > { %v1228_v3 = vpop.xlane.xlu0 %1227 }
 0x3b6   : > { %2251 = vpow2.f32 %v1237_v2  ;;  %v1232_v4 = vsub.f32 %v1213_v50, %v1228_v3 }
 0x3b8   : > { %v1239_v5 = vmul.f32 1.442695, %v1232_v4 }
 0x3ba   : > { %2253 = vpow2.f32 %v1239_v5 }
 0x3bc   : > { %v2250_v6 = vpop.eup %2249 }
 0x3bd   : > { %v1244_v7 = vsel %vm920_vm2, %v2250_v6, 0.0 }
 0x3be   : > { %1245 = vadd.xlane.f32.xlu0 %v1244_v7 }
 0x3c0   : > { %v2252_v8 = vpop.eup %2251 }
 0x3c1   : > { %v1247_v9 = vsel %vm920_vm2, %v2252_v8, 0.0 }
 0x3c2   : > { %1248 = vadd.xlane.f32.xlu1 %v1247_v9 }
 0x3c4   : > { %v2254_v10 = vpop.eup %2253 }
 0x3c5   : > { %v1250_v11 = vsel %vm920_vm2, %v2254_v10, 0.0 }
 0x3c6   : > { %1251 = vadd.xlane.f32.xlu0 %v1250_v11 }
 0x3d3   : > { %917 = vrot.lane.b32.xlu1 %v893_v42, %s2609_s29 }
 0x3dc   : > { %914 = vrot.lane.b32.xlu0 %v893_v42, %s2607_s18  ;;  %s3322_s18 = sld [smem:[#allocation28_spill]] }
 0x3e2   : > { %v1243_v12 = vpop.xlane.xlu1 %1242  ;;  %p3324_p2 = scmp.ne.s32.totalorder %s3322_s18, 0 }
 0x3e3   : > { %2255 = vrcp.f32 %v1243_v12 }
 0x3e4   : > { %p2469_p1 = pnand %p2468_p13, %p3324_p2 }
 0x3e6   : > { %p2470_p12 = pneg %p2469_p1 }
 0x3e8   : > { %p2477_p11 = pnand %p2476_p7, %p2470_p12 }
 0x3ed   : > { %v2256_v13 = vpop.eup %2255 }
 0x3ee   : > { %v1257_v14 = vmul.f32 %v2256_v13, %v2248_v56 }
 0x3f0   : > { %1261 = vst.msk [vmem:[%s3093_s22] sm:$0xff] %vm920_vm2, %v1257_v14  ;;  %2064 = vmatmul.mubr.msk.f32.vlgmr.msra.gmra.mrb[4].mxu0 %vm920_vm2, %v1257_v14 }
 0x3f1   : > { %2073 = vmatprep.mubr.msk.f32.mxu0 %vm2605_vm0, %v2606_v1 }
 0x44b   : > { %v1246_v16 = vpop.xlane.xlu0 %1245 }
 0x44c   : > { %2257 = vrcp.f32 %v1246_v16 }
 0x44f   : > { %v1249_v17 = vpop.xlane.xlu1 %1248 }
 0x450   : > { %2259 = vrcp.f32 %v1249_v17 }
 0x453   : > { %v1252_v18 = vpop.xlane.xlu0 %1251  ;;  %v918_v22 = vpop.permute.xlu1 %917 }
 0x454   : > { %2261 = vrcp.f32 %v1252_v18 }
 0x456   : > { %v2258_v19 = vpop.eup %2257 }
 0x457   : > { %v1258_v20 = vmul.f32 %v2258_v19, %v2250_v6  ;;  %v915_v21 = vpop.permute.xlu0 %914 }
 0x458   : > { %2072 = vmatpush3.msra.mxu0 %v915_v21 }
 0x459   : > { %1262 = vst.msk [vmem:[%s3093_s22 + $0x8] sm:$0xff] %vm920_vm2, %v1258_v20  ;;  %2069 = vmatmul.mubr.msk.f32.vlgmr.msra.gmra.mrb[10].mxu1 %vm920_vm2, %v1258_v20  ;;  %2110 = vmatprep.subr.bf16.mxu0 %v2604_v0 }
 0x45a   : > { %v2260_v23 = vpop.eup %2259  ;;  %2077 = vmatpush3.msra.mxu1 %v918_v22  ;;  %2078 = vmatprep.mubr.msk.f32.mxu1 %vm2605_vm0, %v2606_v1 }
 0x45b   : > { %v1259_v24 = vmul.f32 %v2260_v23, %v2252_v8 }
 0x45d   : > { %1263 = vst.msk [vmem:[%s3093_s22 + $0x10] sm:$0xff] %vm920_vm2, %v1259_v24  ;;  %2074 = vmatmul.mubr.msk.f32.vlgmr.msra.gmra.mrb[6].mxu0 %vm920_vm2, %v1259_v24 }
 0x45e   : > { %v2262_v25 = vpop.eup %2261  ;;  %2089 = vmatprep.mubr.msk.f32.mxu0 %vm2605_vm0, %v2606_v1  ;;  %2112 = vmatpush3.bf16.msra.mxu0 %v2111_v31  ;;  %v1576_v1 = vld [vmem:[%s3319_s25 + $0x10] sm:$0xff] }
 0x45f   : > { %v1260_v26 = vmul.f32 %v2262_v25, %v2254_v10  ;;  %2113 = vmatprep.subr.bf16.mxu0 %v2604_v0  ;;  %v2114_v33 = vpack.c.bf16 %v1577_v32, %v1576_v1 }
 0x461   : > { %1264 = vst.msk [vmem:[%s3093_s22 + $0x18] sm:$0xff] %vm920_vm2, %v1260_v26  ;;  %2079 = vmatmul.mubr.msk.f32.vlgmr.msra.gmra.mrb[12].mxu1 %vm920_vm2, %v1260_v26 }
 0x462   : > { %2115 = vmatpush3.bf16.msra.mxu0 %v2114_v33 }
 0x4c3   : > { %v1334_v27 = vpop.f32.mrb[4].mxu0 }
 0x4c4   : > { %v2065_v28 = vpop.f32.mrb[5].mxu0 }
 0x52c   : > { %v1407_v34 = vpop.f32.mrb[10].mxu1 }
 0x52d   : > { %1558 = vrot.lane.b32.xlu1 %v1407_v34, %s2610_s26  ;;  %v2070_v35 = vpop.f32.mrb[11].mxu1 }
 0x530   : > { %v1480_v36 = vpop.f32.mrb[6].mxu0 }
 0x531   : > { %1562 = vrot.lane.b32.xlu0 %v1480_v36, %s2611_s28  ;;  %v2075_v37 = vpop.f32.mrb[7].mxu0 }
 0x534   : > { %v1553_v0 = vpop.f32.mrb[12].mxu1 }
 0x535   : > { %1566 = vrot.lane.b32.xlu1 %v1553_v0, %s2612_s14  ;;  %v2080_v38 = vpop.f32.mrb[13].mxu1 }
 0x59f   : > { %v1559_v39 = vpop.permute.xlu1 %1558 }
 0x5a0   : > { %v1569_v41 = vsel %vm920_vm2, %v1334_v27, %v1559_v39 }
 0x5a3   : > { %v1563_v40 = vpop.permute.xlu0 %1562 }
 0x5a4   : > { %v1571_v42 = vsel %vm1570_vm3, %v1569_v41, %v1563_v40 }
 0x5a7   : > { %v1567_v43 = vpop.permute.xlu1 %1566 }
 0x5a8   : > { %v1573_v44 = vsel %vm1572_vm4, %v1571_v42, %v1567_v43 }
 0x5a9   : > { %2090 = vmatmul.mubr.msk.f32.vlgmr.msra.gmra.mrb[8].mxu0 %vm654_vm1, %v1573_v44 }
 0x67c   : > { %v1654_v46 = vpop.f32.mrb[8].mxu0 }
 0x67d   : > { %v1655_v47 = vadd.f32 %v1962_v45, %v1654_v46  ;;  %v2091_v48 = vpop.f32.mrb[9].mxu0 }
 0x67f   : > { %v1658_v49 = vadd.f32 %v1655_v47, %v3029_v15 }
 0x681   : > { %v1659_v50 = vsel %vm654_vm1, %v1658_v49, 0.0 }
 0x682   : > { %1660 = vadd.xlane.f32.xlu0 %v1659_v50 }
 0x70f   : > { %v1661_v51 = vpop.xlane.xlu0 %1660 }
 0x710   : > { %v1663_v52 = vmul.f32 0.03125, %v1661_v51 }
 0x712   : > { %v1664_v53 = vsub.f32 %v1658_v49, %v1663_v52 }
 0x714   : > { %v1665_v54 = vmul.f32 %v1664_v53, %v1664_v53 }
 0x716   : > { %v1666_v55 = vsel %vm654_vm1, %v1665_v54, 0.0 }
 0x717   : > { %1667 = vadd.xlane.f32.xlu1 %v1666_v55 }
 0x718   : > { %2480 = shalt.err (!%p2477_p11)
}
 0x719   : > { %s2481_s22 = scalar_lea.hbm %s3142_s12, 512  ;;  %s2485_s21 = scalar_lea.hbm %s3323_s9, 1024 }
 0x71a   : > { %p2482_p5 = scmp.ne.s32.totalorder %s3142_s12, %s2481_s22  ;;  %p2486_p0 = scmp.lt.u32.totalorder %s3142_s12, %s3323_s9 }
 0x71b   : > { %p2487_p4 = scmp.lt.u32.totalorder %s2485_s21, %s2481_s22  ;;  %p2489_p13 = scmp.lt.u32.totalorder %s2481_s22, %s3142_s12 }
 0x71c   : > { %p2483_p3 = pnand %p2482_p5, %p3324_p2 }
 0x71d   : > { %p2488_p10 = por %p2487_p4, %p2486_p0 }
 0x71e   : > { %p2484_p6 = pneg %p2483_p3 }
 0x71f   : > { %p2490_p1 = por %p2489_p13, %p2488_p10 }
 0x721   : > { %p2491_p12 = pnand %p2490_p1, %p2484_p6 }
 0x723   : > { %2494 = shalt.err (!%p2491_p12)
}
 0x724   : > { %s2614_s29 = smov 128   ;;  %s2615_s13 = smov 256  }
 0x725   : > { %2139 = dma.vmem_to_hbm [thread:$0]  (%p3324_p2), %s3145_s16, 512, %s3142_s12, %s1696_s23, %s2614_s29, %s2615_s13, %s2610_s26  }
 0x726   : > { %s3325_s7 = sld [smem:[#allocation36_spill]]  ;;  %s3326_s28 = sld [smem:[#allocation37_spill]] }
 0x727   : > { %s632_s14 = scalar_lea.vmem [#allocation14], %s2994_s10  ;;  %s3327_s16 = sld [smem:[#allocation38_spill]] }
 0x728   : > { %s1710_s21 = sshll.u32 %s632_s14, 4  ;;  %s1691_s27 = scalar_lea.sflag [#allocation4], %s2991_s17  ;;  %s3186_s21 = int_to_ptr.vmem [resolvable:$true] %s1710_s21 }
 0x729   : > { %s2495_s29 = scalar_lea.vmem %s3186_s21, 128  ;;  %s2616_s10 = smov [#allocation14]  }
 0x72a   : > { %p2496_p8 = scmp.ne.s32.totalorder %s3186_s21, %s2495_s29  ;;  %s2499_s19 = sshll.u32 %s2616_s10, 4  ;;  %s2500_s19 = int_to_ptr.vmem [resolvable:$false] %s2499_s19 }
 0x72b   : > { %s2501_s13 = scalar_lea.vmem %s2500_s19, 256  ;;  %p2502_p11 = scmp.lt.s32.totalorder %s3186_s21, %s2500_s19 }
 0x72c   : > { %v1964_v59 = vld [vmem:[%s3325_s7] ss:$0 sm:$0xff]  ;;  %p2497_p9 = pnand %p2496_p8, %p3324_p2  ;;  %p2503_p5 = scmp.lt.s32.totalorder %s2501_s13, %s2495_s29 }
 0x72d   : > { %v1965_v61 = vld [vmem:[%s3326_s28] ss:$0 sm:$0xff]  ;;  %s3328_s23 = smov %s3327_s16  ;;  %s3184_s11 = scalar_lea.hbm %s3327_s16, %s1968_s3 }
 0x72e   : > { %p2498_p7 = pneg %p2497_p9  ;;  %p2504_p3 = por %p2503_p5, %p2502_p11 }
 0x730   : > { %p2505_p6 = pnand %p2504_p3, %p2498_p7 }
 0x7a4   : > { %v1668_v15 = vpop.xlane.xlu1 %1667 }
 0x7a5   : > { %v1669_v56 = vmul.f32 0.03125, %v1668_v15 }
 0x7a7   : > { %v1670_v57 = vadd.f32 1e-05, %v1669_v56 }
 0x7a9   : > { %2263 = vrsqrt.f32 %v1670_v57 }
 0x7b3   : > { %v2264_v58 = vpop.eup %2263 }
 0x7b4   : > { %v1672_v60 = vmul.f32 %v2264_v58, %v1664_v53 }
 0x7b6   : > { %v1680_v62 = vmul.f32 %v1964_v59, %v1672_v60 }
 0x7b8   : > { %v1688_v63 = vadd.f32 %v1965_v61, %v1680_v62 }
 0x7ba   : > { %1689 = vst.msk [vmem:[%s632_s14] sm:$0xff] %vm654_vm1, %v1688_v63 }
 0x7bb   : > { %2508 = shalt.err (!%p2505_p6)
}
 0x7bc   : > { %s2509_s17 = scalar_lea.hbm %s3184_s11, 128  ;;  %s2513_s24 = scalar_lea.hbm %s3328_s23, 256 }
 0x7bd   : > { %p2510_p0 = scmp.ne.s32.totalorder %s3184_s11, %s2509_s17  ;;  %p2514_p13 = scmp.lt.u32.totalorder %s3184_s11, %s3328_s23 }
 0x7be   : > { %p2515_p1 = scmp.lt.u32.totalorder %s2513_s24, %s2509_s17  ;;  %p2517_p8 = scmp.lt.u32.totalorder %s2509_s17, %s3184_s11 }
 0x7bf   : > { %p2511_p4 = pnand %p2510_p0, %p3324_p2 }
 0x7c0   : > { %p2516_p12 = por %p2515_p1, %p2514_p13 }
 0x7c1   : > { %p2512_p10 = pneg %p2511_p4 }
 0x7c2   : > { %p2518_p9 = por %p2517_p8, %p2516_p12 }
 0x7c4   : > { %p2519_p7 = pnand %p2518_p9, %p2512_p10 }
 0x7c6   : > { %2522 = shalt.err (!%p2519_p7)
}
 0x7c7   : > { %2138 = dma.vmem_to_hbm [thread:$0]  (%p3324_p2), %s3186_s21, 128, %s3184_s11, %s1691_s27  }
 0x7c8 PF: > { %s3329_s22 = sld [smem:[#allocation23_spill]]  ;;  %s3330_s28 = sld [smem:[#allocation30_spill]] }
 0x7c9   : > { %s3331_s14 = sld [smem:[#allocation26_spill]] }
 0x7ce   : > { %s1738_s26 = sand.u32 1, %s3329_s22   ;;  %p3332_p11 = scmp.ne.s32.totalorder %s3330_s28, 0 }
 0x7cf   : > { %p3333_p5 = scmp.ge.s32.totalorder %s3331_s14, 2  ;;  %s1739_s12 = scalar_lea.sflag [#allocation4], %s1738_s26 }
 0x7d1   : > { %p2166_p3 = pnand %p3333_p5, %p3332_p11 }
 0x7d3   : > { %2564 = dma.done.wait (!%p2166_p3), %s1739_s12, 128  }
 0x7d4   : > { %2566 = vsyncadd (!%p2166_p3), %s1739_s12, 4294967168  ;;  %s1748_s16 = scalar_lea.sflag [#allocation16], %s1738_s26 }
 0x7d5   : > { %2568 = dma.done.wait (!%p2166_p3), %s1748_s16, 512  }
 0x7d6   : > { %2570 = vsyncadd (!%p2166_p3), %s1748_s16, 4294966784  ;;  %s39_s18 = sadd.s32 1, %s3331_s14   ;;  %s3334_s21 = sld [smem:[#allocation29_spill]] }
 0x7d7   : > { %p36_p6 = scmp.ge.s32.totalorder %s39_s18, 4   ;;  %s3335_s16 = sld [smem:[#allocation25_spill]] }
 0x7d8   : > { %s3336_s17 = sld [smem:[#allocation27_spill]]  ;;  %s3337_s29 = smov %s2577_s30 }
 0x7d9   : > { %s3338_s30 = smov %s2581_s15  ;;  %38 = sbr.rel (!%p36_p6) target bundleno = 22 (0x16), region = 174 }
 0x7dc   : > { %s3339_s15 = smov %s3334_s21 }
 0x7e0   :  { %1753 = vsyncpa [#allocation3], 1 }
 0x7e1   :  { %1755 = vsyncpa [#allocation3 + $0x1], 1 }
 0x7e2   :  { %1756 = vsyncpa [#allocation6], 1 }
 0x7e3   :  { %1758 = vsyncpa [#allocation6 + $0x1], 1 }
 0x7e4   :  { %1759 = vsyncpa [#allocation9], 1 }
 0x7e5   :  { %1760 = vsyncpa [#allocation12], 1 }
 0x7e6   :  { %1761 = vsyncpa [#allocation4], 1 }
 0x7e7   :  { %1763 = vsyncpa [#allocation4 + $0x1], 1 }
 0x7e8   :  { %1764 = vsyncpa [#allocation16], 1 }
 0x7e9   :  { %1766 = vsyncpa [#allocation16 + $0x1], 1 }

</bundles_post_ra>
